<compile_context>
chip_gen: v7x
topology: tpu7x:2x2x1
jax: 0.10.0
libtpu: 0.0.40
codegen_flags: <defaults>
</compile_context>

<pallas_src>
import functools

import jax
import jax.numpy as jnp
from jax.experimental import pallas as pl
from jax.experimental.pallas import tpu as pltpu

IN_DIM = 320      # feature_dim['facebook/esm2_t6_8M_UR50D']
HIDDEN = 512
OUT_DIM = 256
LN_EPS = 1e-5


def _round_up(n, m):
    return ((n + m - 1) // m) * m


def _layernorm(h, gamma, beta):
    mu = jnp.mean(h, axis=-1, keepdims=True)
    c = h - mu                                   # hoisted: reused for var + normalization
    var = jnp.mean(c * c, axis=-1, keepdims=True)
    return c * jax.lax.rsqrt(var + LN_EPS) * gamma + beta


def _mlp_kernel(x_ref,
                w1_ref, b1_ref, g1_ref, be1_ref,
                w2_ref, b2_ref, g2_ref, be2_ref,
                w3_ref, b3_ref,
                o_ref):
    # x arrives f32; cast to bf16 here (free VPU filler) rather than in the wrapper.
    x = x_ref[...].astype(jnp.bfloat16)                              # (TB, IN_DIM)

    # fc1 (bf16 MXU, f32 accum) + ln1 + (dropout=identity) + relu
    h = jnp.dot(x, w1_ref[...], preferred_element_type=jnp.float32) + b1_ref[...]
    h = _layernorm(h, g1_ref[...], be1_ref[...])
    h = jnp.maximum(h, 0.0)

    # fc2 + ln2 + (dropout=identity) + relu
    h = jnp.dot(h.astype(jnp.bfloat16), w2_ref[...],
                preferred_element_type=jnp.float32) + b2_ref[...]
    h = _layernorm(h, g2_ref[...], be2_ref[...])
    h = jnp.maximum(h, 0.0)

    # fc3
    o_ref[...] = (jnp.dot(h.astype(jnp.bfloat16), w3_ref[...],
                          preferred_element_type=jnp.float32)
                  + b3_ref[...]).astype(o_ref.dtype)


@functools.partial(jax.jit, static_argnames=("block_b",))
def layernorm_net(x, params, block_b=512):
    """x: (B, IN_DIM) float32 -> (B, OUT_DIM) float32.

    params: (w1[bf16], b1, g1, be1, w2[bf16], b2, g2, be2, w3[bf16], b3)
    (use prepare_params() to cast the weight matrices once, outside jit).
    """
    B = x.shape[0]
    w1, b1, g1, be1, w2, b2, g2, be2, w3, b3 = params

    # Tile selection:
    #   * multiple of 16 rows (bf16 sublane packing, avoids masked stores),
    #   * capped at block_b,
    #   * ~B/4 so large batches get >= 4 grid steps (>= 2 per TensorCore on
    #     v7x with megacore sharding, so double-buffered DMA overlaps compute;
    #     v5e/v6e get >= 2 sequential steps for the same reason).
    # No explicit padding: Pallas masks the ragged last block's output write,
    # and every op is row-independent so padded garbage rows are harmless.
    block = max(16, min(block_b, _round_up(pl.cdiv(B, 4), 16)))
    grid = pl.cdiv(B, block)

    # Weights / biases / LN params use a constant index_map -> their block never
    # changes across the grid, so Pallas does not re-DMA them per step.
    full = lambda shape: pl.BlockSpec(shape, lambda i: (0, 0))
    in_specs = [
        pl.BlockSpec((block, IN_DIM), lambda i: (i, 0)),     # x (f32, cast in-kernel)
        full((IN_DIM, HIDDEN)), full((1, HIDDEN)),           # w1 (bf16), b1
        full((1, HIDDEN)), full((1, HIDDEN)),                # ln1 gamma, beta
        full((HIDDEN, HIDDEN)), full((1, HIDDEN)),           # w2 (bf16), b2
        full((1, HIDDEN)), full((1, HIDDEN)),                # ln2 gamma, beta
        full((HIDDEN, OUT_DIM)), full((1, OUT_DIM)),         # w3 (bf16), b3
    ]

    return pl.pallas_call(
        _mlp_kernel,
        out_shape=jax.ShapeDtypeStruct((B, OUT_DIM), jnp.float32),
        grid_spec=pltpu.PrefetchScalarGridSpec(
            num_scalar_prefetch=0,
            grid=(grid,),
            in_specs=in_specs,
            out_specs=pl.BlockSpec((block, OUT_DIM), lambda i: (i, 0)),
        ),
        compiler_params=pltpu.CompilerParams(
            dimension_semantics=("parallel",)),
    )(x, w1, b1, g1, be1, w2, b2, g2, be2, w3, b3)


def init_params(key):
    """Deterministic synthetic f32 parameters (same shapes as the PyTorch module)."""
    ks = jax.random.split(key, 6)
    # Linear weights stored as (in, out) == PyTorch weight.T
    w1 = jax.random.normal(ks[0], (IN_DIM, HIDDEN), jnp.float32) * 0.02
    b1 = jax.random.normal(ks[1], (1, HIDDEN), jnp.float32) * 0.02
    w2 = jax.random.normal(ks[2], (HIDDEN, HIDDEN), jnp.float32) * 0.02
    b2 = jax.random.normal(ks[3], (1, HIDDEN), jnp.float32) * 0.02
    w3 = jax.random.normal(ks[4], (HIDDEN, OUT_DIM), jnp.float32) * 0.02
    b3 = jax.random.normal(ks[5], (1, OUT_DIM), jnp.float32) * 0.02
    # LayerNorm affine params (PyTorch default init: gamma=1, beta=0)
    g1 = jnp.ones((1, HIDDEN), jnp.float32)
    be1 = jnp.zeros((1, HIDDEN), jnp.float32)
    g2 = jnp.ones((1, HIDDEN), jnp.float32)
    be2 = jnp.zeros((1, HIDDEN), jnp.float32)
    return (w1, b1, g1, be1, w2, b2, g2, be2, w3, b3)


def prepare_params(params):
    """One-time (outside jit) cast of the three weight matrices to bf16 for the MXU."""
    w1, b1, g1, be1, w2, b2, g2, be2, w3, b3 = params
    return (w1.astype(jnp.bfloat16), b1, g1, be1,
            w2.astype(jnp.bfloat16), b2, g2, be2,
            w3.astype(jnp.bfloat16), b3)


def reference(x, params):
    """Pure f32 reference of the PyTorch forward (dropout in eval mode)."""
    w1, b1, g1, be1, w2, b2, g2, be2, w3, b3 = params
    h = x @ w1 + b1
    h = (h - h.mean(-1, keepdims=True)) / jnp.sqrt(h.var(-1, keepdims=True) + LN_EPS) * g1 + be1
    h = jnp.maximum(h, 0.0)
    h = h @ w2 + b2
    h = (h - h.mean(-1, keepdims=True)) / jnp.sqrt(h.var(-1, keepdims=True) + LN_EPS) * g2 + be2
    h = jnp.maximum(h, 0.0)
    return h @ w3 + b3


if __name__ == "__main__":
    key = jax.random.PRNGKey(0)
    kx, kp = jax.random.split(key)

    params_f32 = init_params(kp)
    params = prepare_params(params_f32)   # one-time bf16 weight cast, outside jit

    # Test 1: small batch (B smaller than the 16-row tile -> single ragged block).
    B1 = 8
    x1 = jax.random.normal(kx, (B1, IN_DIM), jnp.float32)
    out1 = jax.block_until_ready(layernorm_net(x1, params))
    ref1 = reference(x1, params_f32)
    assert out1.shape == (B1, OUT_DIM), out1.shape
    err1 = float(jnp.max(jnp.abs(out1 - ref1)))
    assert err1 < 5e-2, err1

    # Test 2: batch not a multiple of the tile -> multiple grid steps with a
    # masked ragged last block (verifies edge-block handling on device).
    B2 = 40
    x2 = jax.random.normal(jax.random.fold_in(kx, 1), (B2, IN_DIM), jnp.float32)
    out2 = jax.block_until_ready(layernorm_net(x2, params))
    ref2 = reference(x2, params_f32)
    assert out2.shape == (B2, OUT_DIM), out2.shape
    err2 = float(jnp.max(jnp.abs(out2 - ref2)))
    assert err2 < 5e-2, err2

    print("KERNEL_OK")
</pallas_src>

<mosaic_0001>
module attributes {stable_mosaic.version = 11 : i64} {
  func.func @_mlp_kernel(%arg0: i32, %arg1: memref<16x320xf32, #tpu.memory_space<vmem>>, %arg2: memref<320x512xbf16, #tpu.memory_space<vmem>>, %arg3: memref<1x512xf32, #tpu.memory_space<vmem>>, %arg4: memref<1x512xf32, #tpu.memory_space<vmem>>, %arg5: memref<1x512xf32, #tpu.memory_space<vmem>>, %arg6: memref<512x512xbf16, #tpu.memory_space<vmem>>, %arg7: memref<1x512xf32, #tpu.memory_space<vmem>>, %arg8: memref<1x512xf32, #tpu.memory_space<vmem>>, %arg9: memref<1x512xf32, #tpu.memory_space<vmem>>, %arg10: memref<512x256xbf16, #tpu.memory_space<vmem>>, %arg11: memref<1x256xf32, #tpu.memory_space<vmem>>, %arg12: memref<16x256xf32, #tpu.memory_space<vmem>>) attributes {dimension_semantics = [#tpu.dimension_semantics<parallel>], iteration_bounds = array<i64: 1>, scalar_prefetch = 0 : i64, scratch_operands = 0 : i64, tpu.core_type = #tpu.core_type<tc>, window_params = [{transform_indices = @transform_0, window_bounds = array<i64: 16, 320>}, {pipeline_mode = #tpu.pipeline_mode<synchronous>, transform_indices = @transform_1, window_bounds = array<i64: 320, 512>}, {pipeline_mode = #tpu.pipeline_mode<synchronous>, transform_indices = @transform_2, window_bounds = array<i64: 1, 512>}, {pipeline_mode = #tpu.pipeline_mode<synchronous>, transform_indices = @transform_3, window_bounds = array<i64: 1, 512>}, {pipeline_mode = #tpu.pipeline_mode<synchronous>, transform_indices = @transform_4, window_bounds = array<i64: 1, 512>}, {pipeline_mode = #tpu.pipeline_mode<synchronous>, transform_indices = @transform_5, window_bounds = array<i64: 512, 512>}, {pipeline_mode = #tpu.pipeline_mode<synchronous>, transform_indices = @transform_6, window_bounds = array<i64: 1, 512>}, {pipeline_mode = #tpu.pipeline_mode<synchronous>, transform_indices = @transform_7, window_bounds = array<i64: 1, 512>}, {pipeline_mode = #tpu.pipeline_mode<synchronous>, transform_indices = @transform_8, window_bounds = array<i64: 1, 512>}, {pipeline_mode = #tpu.pipeline_mode<synchronous>, transform_indices = @transform_9, window_bounds = array<i64: 512, 256>}, {pipeline_mode = #tpu.pipeline_mode<synchronous>, transform_indices = @transform_10, window_bounds = array<i64: 1, 256>}, {transform_indices = @transform_11, window_bounds = array<i64: 16, 256>}]} {
    %c0 = arith.constant 0 : index
    %c0_0 = arith.constant 0 : index
    %0 = vector.load %arg1[%c0, %c0_0] : memref<16x320xf32, #tpu.memory_space<vmem>>, vector<16x320xf32>
    %1 = arith.truncf %0 : vector<16x320xf32> to vector<16x320xbf16>
    %c0_1 = arith.constant 0 : index
    %c0_2 = arith.constant 0 : index
    %2 = vector.load %arg2[%c0_1, %c0_2] : memref<320x512xbf16, #tpu.memory_space<vmem>>, vector<320x512xbf16>
    %cst = arith.constant dense<0.000000e+00> : vector<16x512xf32>
    %3 = tpu.matmul %1, %2, %cst {dimension_numbers = #tpu.dot_dimension_numbers<[1], [0], [0], [1], [0, 0, 1, 1], [], []>} : vector<16x320xbf16>, vector<320x512xbf16>, vector<16x512xf32> -> vector<16x512xf32>
    %c0_3 = arith.constant 0 : index
    %c0_4 = arith.constant 0 : index
    %4 = vector.load %arg3[%c0_3, %c0_4] : memref<1x512xf32, #tpu.memory_space<vmem>>, vector<1x512xf32>
    %5 = vector.broadcast %4 : vector<1x512xf32> to vector<16x512xf32>
    %6 = arith.addf %3, %5 : vector<16x512xf32>
    %c0_5 = arith.constant 0 : index
    %c0_6 = arith.constant 0 : index
    %7 = vector.load %arg4[%c0_5, %c0_6] : memref<1x512xf32, #tpu.memory_space<vmem>>, vector<1x512xf32>
    %c0_7 = arith.constant 0 : index
    %c0_8 = arith.constant 0 : index
    %8 = vector.load %arg5[%c0_7, %c0_8] : memref<1x512xf32, #tpu.memory_space<vmem>>, vector<1x512xf32>
    %cst_9 = arith.constant dense<0.000000e+00> : vector<16xf32>
    %9 = vector.multi_reduction <add>, %6, %cst_9 [1] : vector<16x512xf32> to vector<16xf32>
    %10 = vector.shape_cast %9 : vector<16xf32> to vector<16x1xf32>
    %cst_10 = arith.constant 5.120000e+02 : f32
    %11 = vector.broadcast %cst_10 : f32 to vector<16x1xf32>
    %12 = arith.divf %10, %11 : vector<16x1xf32>
    %13 = vector.broadcast %12 : vector<16x1xf32> to vector<16x512xf32>
    %14 = arith.subf %6, %13 : vector<16x512xf32>
    %15 = arith.mulf %14, %14 : vector<16x512xf32>
    %cst_11 = arith.constant dense<0.000000e+00> : vector<16xf32>
    %16 = vector.multi_reduction <add>, %15, %cst_11 [1] : vector<16x512xf32> to vector<16xf32>
    %17 = vector.shape_cast %16 : vector<16xf32> to vector<16x1xf32>
    %cst_12 = arith.constant 5.120000e+02 : f32
    %18 = vector.broadcast %cst_12 : f32 to vector<16x1xf32>
    %19 = arith.divf %17, %18 : vector<16x1xf32>
    %cst_13 = arith.constant 9.99999974E-6 : f32
    %20 = vector.broadcast %cst_13 : f32 to vector<16x1xf32>
    %21 = arith.addf %19, %20 : vector<16x1xf32>
    %22 = math.rsqrt %21 : vector<16x1xf32>
    %23 = vector.broadcast %22 : vector<16x1xf32> to vector<16x512xf32>
    %24 = arith.mulf %14, %23 : vector<16x512xf32>
    %25 = vector.broadcast %7 : vector<1x512xf32> to vector<16x512xf32>
    %26 = arith.mulf %24, %25 : vector<16x512xf32>
    %27 = vector.broadcast %8 : vector<1x512xf32> to vector<16x512xf32>
    %28 = arith.addf %26, %27 : vector<16x512xf32>
    %cst_14 = arith.constant 0.000000e+00 : f32
    %29 = vector.broadcast %cst_14 : f32 to vector<16x512xf32>
    %30 = arith.maximumf %28, %29 : vector<16x512xf32>
    %31 = arith.truncf %30 : vector<16x512xf32> to vector<16x512xbf16>
    %c0_15 = arith.constant 0 : index
    %c0_16 = arith.constant 0 : index
    %32 = vector.load %arg6[%c0_15, %c0_16] : memref<512x512xbf16, #tpu.memory_space<vmem>>, vector<512x512xbf16>
    %cst_17 = arith.constant dense<0.000000e+00> : vector<16x512xf32>
    %33 = tpu.matmul %31, %32, %cst_17 {dimension_numbers = #tpu.dot_dimension_numbers<[1], [0], [0], [1], [0, 0, 1, 1], [], []>} : vector<16x512xbf16>, vector<512x512xbf16>, vector<16x512xf32> -> vector<16x512xf32>
    %c0_18 = arith.constant 0 : index
    %c0_19 = arith.constant 0 : index
    %34 = vector.load %arg7[%c0_18, %c0_19] : memref<1x512xf32, #tpu.memory_space<vmem>>, vector<1x512xf32>
    %35 = vector.broadcast %34 : vector<1x512xf32> to vector<16x512xf32>
    %36 = arith.addf %33, %35 : vector<16x512xf32>
    %c0_20 = arith.constant 0 : index
    %c0_21 = arith.constant 0 : index
    %37 = vector.load %arg8[%c0_20, %c0_21] : memref<1x512xf32, #tpu.memory_space<vmem>>, vector<1x512xf32>
    %c0_22 = arith.constant 0 : index
    %c0_23 = arith.constant 0 : index
    %38 = vector.load %arg9[%c0_22, %c0_23] : memref<1x512xf32, #tpu.memory_space<vmem>>, vector<1x512xf32>
    %cst_24 = arith.constant dense<0.000000e+00> : vector<16xf32>
    %39 = vector.multi_reduction <add>, %36, %cst_24 [1] : vector<16x512xf32> to vector<16xf32>
    %40 = vector.shape_cast %39 : vector<16xf32> to vector<16x1xf32>
    %cst_25 = arith.constant 5.120000e+02 : f32
    %41 = vector.broadcast %cst_25 : f32 to vector<16x1xf32>
    %42 = arith.divf %40, %41 : vector<16x1xf32>
    %43 = vector.broadcast %42 : vector<16x1xf32> to vector<16x512xf32>
    %44 = arith.subf %36, %43 : vector<16x512xf32>
    %45 = arith.mulf %44, %44 : vector<16x512xf32>
    %cst_26 = arith.constant dense<0.000000e+00> : vector<16xf32>
    %46 = vector.multi_reduction <add>, %45, %cst_26 [1] : vector<16x512xf32> to vector<16xf32>
    %47 = vector.shape_cast %46 : vector<16xf32> to vector<16x1xf32>
    %cst_27 = arith.constant 5.120000e+02 : f32
    %48 = vector.broadcast %cst_27 : f32 to vector<16x1xf32>
    %49 = arith.divf %47, %48 : vector<16x1xf32>
    %cst_28 = arith.constant 9.99999974E-6 : f32
    %50 = vector.broadcast %cst_28 : f32 to vector<16x1xf32>
    %51 = arith.addf %49, %50 : vector<16x1xf32>
    %52 = math.rsqrt %51 : vector<16x1xf32>
    %53 = vector.broadcast %52 : vector<16x1xf32> to vector<16x512xf32>
    %54 = arith.mulf %44, %53 : vector<16x512xf32>
    %55 = vector.broadcast %37 : vector<1x512xf32> to vector<16x512xf32>
    %56 = arith.mulf %54, %55 : vector<16x512xf32>
    %57 = vector.broadcast %38 : vector<1x512xf32> to vector<16x512xf32>
    %58 = arith.addf %56, %57 : vector<16x512xf32>
    %cst_29 = arith.constant 0.000000e+00 : f32
    %59 = vector.broadcast %cst_29 : f32 to vector<16x512xf32>
    %60 = arith.maximumf %58, %59 : vector<16x512xf32>
    %61 = arith.truncf %60 : vector<16x512xf32> to vector<16x512xbf16>
    %c0_30 = arith.constant 0 : index
    %c0_31 = arith.constant 0 : index
    %62 = vector.load %arg10[%c0_30, %c0_31] : memref<512x256xbf16, #tpu.memory_space<vmem>>, vector<512x256xbf16>
    %cst_32 = arith.constant dense<0.000000e+00> : vector<16x256xf32>
    %63 = tpu.matmul %61, %62, %cst_32 {dimension_numbers = #tpu.dot_dimension_numbers<[1], [0], [0], [1], [0, 0, 1, 1], [], []>} : vector<16x512xbf16>, vector<512x256xbf16>, vector<16x256xf32> -> vector<16x256xf32>
    %c0_33 = arith.constant 0 : index
    %c0_34 = arith.constant 0 : index
    %64 = vector.load %arg11[%c0_33, %c0_34] : memref<1x256xf32, #tpu.memory_space<vmem>>, vector<1x256xf32>
    %65 = vector.broadcast %64 : vector<1x256xf32> to vector<16x256xf32>
    %66 = arith.addf %63, %65 : vector<16x256xf32>
    %c0_35 = arith.constant 0 : index
    %c0_36 = arith.constant 0 : index
    %67 = vector.load %arg12[%c0_35, %c0_36] : memref<16x256xf32, #tpu.memory_space<vmem>>, vector<16x256xf32>
    tpu.vector_store %arg12[%c0_35, %c0_36], %66 {strides = array<i32>} : memref<16x256xf32, #tpu.memory_space<vmem>>, vector<16x256xf32>,
    return
  }
  func.func @transform_0(%arg0: i32) -> (i32, i32) {
    %c0_i32 = arith.constant 0 : i32
    %c0_i32_0 = arith.constant 0 : i32
    return %arg0, %c0_i32 : i32, i32
  }
  func.func @transform_1(%arg0: i32) -> (i32, i32) {
    %c0_i32 = arith.constant 0 : i32
    %c0_i32_0 = arith.constant 0 : i32
    %c0_i32_1 = arith.constant 0 : i32
    return %c0_i32, %c0_i32_0 : i32, i32
  }
  func.func @transform_2(%arg0: i32) -> (i32, i32) {
    %c0_i32 = arith.constant 0 : i32
    %c0_i32_0 = arith.constant 0 : i32
    %c0_i32_1 = arith.constant 0 : i32
    return %c0_i32, %c0_i32_0 : i32, i32
  }
  func.func @transform_3(%arg0: i32) -> (i32, i32) {
    %c0_i32 = arith.constant 0 : i32
    %c0_i32_0 = arith.constant 0 : i32
    %c0_i32_1 = arith.constant 0 : i32
    return %c0_i32, %c0_i32_0 : i32, i32
  }
  func.func @transform_4(%arg0: i32) -> (i32, i32) {
    %c0_i32 = arith.constant 0 : i32
    %c0_i32_0 = arith.constant 0 : i32
    %c0_i32_1 = arith.constant 0 : i32
    return %c0_i32, %c0_i32_0 : i32, i32
  }
  func.func @transform_5(%arg0: i32) -> (i32, i32) {
    %c0_i32 = arith.constant 0 : i32
    %c0_i32_0 = arith.constant 0 : i32
    %c0_i32_1 = arith.constant 0 : i32
    return %c0_i32, %c0_i32_0 : i32, i32
  }
  func.func @transform_6(%arg0: i32) -> (i32, i32) {
    %c0_i32 = arith.constant 0 : i32
    %c0_i32_0 = arith.constant 0 : i32
    %c0_i32_1 = arith.constant 0 : i32
    return %c0_i32, %c0_i32_0 : i32, i32
  }
  func.func @transform_7(%arg0: i32) -> (i32, i32) {
    %c0_i32 = arith.constant 0 : i32
    %c0_i32_0 = arith.constant 0 : i32
    %c0_i32_1 = arith.constant 0 : i32
    return %c0_i32, %c0_i32_0 : i32, i32
  }
  func.func @transform_8(%arg0: i32) -> (i32, i32) {
    %c0_i32 = arith.constant 0 : i32
    %c0_i32_0 = arith.constant 0 : i32
    %c0_i32_1 = arith.constant 0 : i32
    return %c0_i32, %c0_i32_0 : i32, i32
  }
  func.func @transform_9(%arg0: i32) -> (i32, i32) {
    %c0_i32 = arith.constant 0 : i32
    %c0_i32_0 = arith.constant 0 : i32
    %c0_i32_1 = arith.constant 0 : i32
    return %c0_i32, %c0_i32_0 : i32, i32
  }
  func.func @transform_10(%arg0: i32) -> (i32, i32) {
    %c0_i32 = arith.constant 0 : i32
    %c0_i32_0 = arith.constant 0 : i32
    %c0_i32_1 = arith.constant 0 : i32
    return %c0_i32, %c0_i32_0 : i32, i32
  }
  func.func @transform_11(%arg0: i32) -> (i32, i32) {
    %c0_i32 = arith.constant 0 : i32
    %c0_i32_0 = arith.constant 0 : i32
    return %arg0, %c0_i32 : i32, i32
  }
}

</mosaic_0001>

<bundles_post_ra>
// kernel: layernorm_net.1
= control target key start
LH: loop header
LB: loop body
LE: loop exit
PB: predicated region body
PF: predicated region fallthrough
CT: control target
= control target key end

     0   :  { %16 = vsyncpa [#allocation3], 0  ;;  %s3704_s0 = inlined_call_operand.hbm [shape: f32[8,320], index: 0, kind: input, shape index: {}]   ;;  %s3705_s1 = inlined_call_operand.hbm [shape: bf16[320,512], index: 1, kind: input, shape index: {}]   ;;  %s3706_s2 = inlined_call_operand.vmem [shape: f32[1,512], index: 2, kind: input, shape index: {}]   ;;  %s3707_s3 = inlined_call_operand.vmem [shape: f32[1,512], index: 3, kind: input, shape index: {}]   ;;  %s3708_s4 = inlined_call_operand.vmem [shape: f32[1,512], index: 4, kind: input, shape index: {}]   ;;  %s3709_s5 = inlined_call_operand.hbm [shape: bf16[512,512], index: 5, kind: input, shape index: {}]   ;;  %s3710_s6 = inlined_call_operand.vmem [shape: f32[1,512], index: 6, kind: input, shape index: {}]   ;;  %s3711_s7 = inlined_call_operand.vmem [shape: f32[1,512], index: 7, kind: input, shape index: {}]   ;;  %s3712_s8 = inlined_call_operand.vmem [shape: f32[1,512], index: 8, kind: input, shape index: {}]   ;;  %s3713_s9 = inlined_call_operand.hbm [shape: bf16[512,256], index: 9, kind: input, shape index: {}]   ;;  %s3714_s10 = inlined_call_operand.vmem [shape: f32[1,256], index: 10, kind: input, shape index: {}]   ;;  %s3715_s11 = inlined_call_operand.hbm [shape: f32[8,256], index: 11, kind: output, shape index: {}]  }
   0x1   :  { %17 = vsyncpa [#allocation6], 0 }
   0x2   :  { %18 = vsyncpa [#allocation9], 0 }
   0x3   :  { %19 = vsyncpa [#allocation4], 0 }
   0x4   :  { %24 = vsyncadd [#allocation3], 384  ;;  %s3358_s17 = smov [#allocation5]   ;;  %s3240_s21 = scalar_lea.hbm %s3705_s1, 10240 }
   0x5   :  { %s37_s18 = sshll.u32 %s3358_s17, 4  ;;  %p3241_p0 = scmp.ne.s32.totalorder %s3705_s1, %s3240_s21  ;;  %s38_s18 = int_to_ptr.vmem [resolvable:$true] %s37_s18 }
   0x6   :  { %p3244_p1 = scmp.lt.u32.totalorder %s3240_s21, %s3705_s1 }
   0x8   :  { %p3246_p2 = pnand %p3244_p1, %p3241_p0 }
   0xa   :  { %3249 = shalt.err (!%p3246_p2)
}
   0xb   :  { %s3250_s26 = scalar_lea.vmem %s38_s18, 10240  ;;  %p3255_p4 = scmp.lt.s32.totalorder %s38_s18, %s38_s18 }
   0xc   :  { %p3251_p3 = scmp.ne.s32.totalorder %s38_s18, %s3250_s26  ;;  %p3256_p5 = scmp.lt.s32.totalorder %s3250_s26, %s3250_s26 }
   0xe   :  { %p3257_p6 = por %p3256_p5, %p3255_p4 }
  0x10   :  { %p3258_p7 = pnand %p3257_p6, %p3251_p3 }
  0x12   :  { %3261 = shalt.err (!%p3258_p7)
}
  0x13   :  { %s3359_s27 = smov 256   ;;  %s3360_s28 = smov 16  }
  0x14   :  { %43 = dma.hbm_to_vmem [thread:$0]  %s3705_s1, 10240, %s38_s18, [#allocation6], %s3359_s27, %s3359_s27, %s3360_s28  }
  0x15   :  { %s3361_s12 = smov [#allocation2]   ;;  %s3262_s16 = scalar_lea.hbm %s3704_s0, 384 }
  0x16   :  { %s25_s13 = sshll.u32 %s3361_s12, 4  ;;  %p3263_p8 = scmp.ne.s32.totalorder %s3704_s0, %s3262_s16  ;;  %s26_s13 = int_to_ptr.vmem [resolvable:$true] %s25_s13 }
  0x17   :  { %p3266_p9 = scmp.lt.u32.totalorder %s3262_s16, %s3704_s0 }
  0x19   :  { %p3268_p10 = pnand %p3266_p9, %p3263_p8 }
  0x1b   :  { %3271 = shalt.err (!%p3268_p10)
}
  0x1c   :  { %s3272_s22 = scalar_lea.vmem %s26_s13, 384  ;;  %s3276_s1 = scalar_lea.vmem %s26_s13, 768 }
  0x1d   :  { %p3273_p11 = scmp.ne.s32.totalorder %s26_s13, %s3272_s22  ;;  %p3277_p12 = scmp.lt.s32.totalorder %s26_s13, %s26_s13 }
  0x1e   :  { %p3278_p13 = scmp.lt.s32.totalorder %s3276_s1, %s3272_s22 }
  0x20   :  { %p3279_p0 = por %p3278_p13, %p3277_p12 }
  0x22   :  { %p3280_p1 = pnand %p3279_p0, %p3273_p11 }
  0x24   :  { %3283 = shalt.err (!%p3280_p1)
}
  0x25   :  { %s3362_s18 = smov 384   ;;  %s3363_s23 = smov 24  }
  0x26   :  { %31 = dma.hbm_to_vmem [thread:$0]  %s3704_s0, 384, %s26_s13, [#allocation3], %s3362_s18, %s3362_s18, %s3363_s23  }
  0x27   :  { %s3364_s26 = smov [#allocation7]   ;;  %s3365_s30 = smov [#allocation8]  }
  0x28   :  { %s55_s29 = sshll.u32 %s3364_s26, 4  ;;  %s73_s12 = sshll.u32 %s3365_s30, 4  ;;  %s56_s29 = int_to_ptr.vmem [resolvable:$true] %s55_s29  ;;  %s3457_s12 = int_to_ptr.vmem [resolvable:$true] %s73_s12 }
  0x29   :  { %s3284_s16 = scalar_lea.hbm %s3709_s5, 16384 }
  0x2a   :  { %p3285_p2 = scmp.ne.s32.totalorder %s3709_s5, %s3284_s16  ;;  %p3288_p3 = scmp.lt.u32.totalorder %s3284_s16, %s3709_s5 }
  0x2c   :  { %p3290_p4 = pnand %p3288_p3, %p3285_p2 }
  0x2e   :  { %3293 = shalt.err (!%p3290_p4)
}
  0x2f   :  { %s3294_s0 = scalar_lea.vmem %s56_s29, 16384  ;;  %p3299_p6 = scmp.lt.s32.totalorder %s56_s29, %s56_s29 }
  0x30   :  { %p3295_p5 = scmp.ne.s32.totalorder %s56_s29, %s3294_s0  ;;  %p3300_p7 = scmp.lt.s32.totalorder %s3294_s0, %s3294_s0 }
  0x32   :  { %p3301_p8 = por %p3300_p7, %p3299_p6 }
  0x34   :  { %p3302_p9 = pnand %p3301_p8, %p3295_p5 }
  0x36   :  { %3305 = shalt.err (!%p3302_p9)
}
  0x37   :  { %61 = dma.hbm_to_vmem [thread:$0]  %s3709_s5, 16384, %s56_s29, [#allocation6], %s3359_s27, %s3359_s27, %s3360_s28  }
  0x38   :  { %s3306_s23 = scalar_lea.hbm %s3713_s9, 8192 }
  0x39   :  { %p3307_p10 = scmp.ne.s32.totalorder %s3713_s9, %s3306_s23  ;;  %p3310_p11 = scmp.lt.u32.totalorder %s3306_s23, %s3713_s9 }
  0x3b   :  { %p3312_p12 = pnand %p3310_p11, %p3307_p10 }
  0x3d   :  { %3315 = shalt.err (!%p3312_p12)
}
  0x3e   :  { %s3316_s14 = scalar_lea.vmem %s3457_s12, 8192  ;;  %p3321_p0 = scmp.lt.s32.totalorder %s3457_s12, %s3457_s12 }
  0x3f   :  { %p3317_p13 = scmp.ne.s32.totalorder %s3457_s12, %s3316_s14  ;;  %p3322_p1 = scmp.lt.s32.totalorder %s3316_s14, %s3316_s14 }
  0x41   :  { %p3323_p2 = por %p3322_p1, %p3321_p0 }
  0x43   :  { %p3324_p3 = pnand %p3323_p2, %p3317_p13 }
  0x45   :  { %3327 = shalt.err (!%p3324_p3)
}
  0x46   :  { %s3366_s5 = smov 128   ;;  %s3367_s29 = smov 8  }
  0x47   :  { %79 = dma.hbm_to_vmem [thread:$0]  %s3713_s9, 8192, %s3457_s12, [#allocation9], %s3366_s5, %s3366_s5, %s3367_s29  }
  0x48   :  { %3350 = dma.done.wait [#allocation3], 768  }
  0x49   :  { %3351 = vsyncadd [#allocation3], 4294966528 }
  0x4a   :  { %3352 = dma.done.wait [#allocation6], 26624  }
  0x4b   :  { %3353 = vsyncadd [#allocation6], 4294940672 }
  0x4c   :  { %3354 = dma.done.wait [#allocation9], 8192  }
  0x4d   :  { %3355 = vsyncadd [#allocation9], 4294959104  ;;  %v3368_v0 = vmov 0   ;;  %v2824_v1 = vld [vmem:[#allocation5 + $0x4] ss:$16 sps:$4 sm:$0xff]   ;;  %v96_v23 = vld [vmem:[#allocation2 + $0x8] sm:$0xff] }
  0x4e   :  { %685 = vmatprep.mubr.bf16.mxu0 %v3368_v0  ;;  %v2826_v2 = vld [vmem:[#allocation5] ss:$16 sps:$4 sm:$0xff]   ;;  %610 = vmatprep.subr.bf16.mxu1 %v2824_v1  ;;  %v2827_v3 = vld [vmem:[#allocation5 + $0x24] ss:$16 sps:$4 sm:$0xff]   ;;  %v100_v30 = vld [vmem:[#allocation2 + $0x28] sm:$0xff]  ;;  %vm606_vm0 = vcmask 523264  }
  0x4f   :  { %611 = vmatpush1.bf16.msra.mxu1 %v2826_v2  ;;  %v2829_v4 = vld [vmem:[#allocation5 + $0x20] ss:$16 sps:$4 sm:$0xff]   ;;  %v2830_v5 = vld [vmem:[#allocation5 + $0x44] ss:$16 sps:$4 sm:$0xff]   ;;  %v98_v48 = vld [vmem:[#allocation2 + $0x18] sm:$0xff] }
  0x50   :  { %612 = vmatprep.subr.bf16.mxu1 %v2827_v3  ;;  %v2832_v6 = vld [vmem:[#allocation5 + $0x40] ss:$16 sps:$4 sm:$0xff]   ;;  %v2833_v7 = vld [vmem:[#allocation5 + $0x64] ss:$16 sps:$4 sm:$0xff]   ;;  %v2886_v49 = vld [vmem:[#allocation5 + $0xc] ss:$16 sps:$4 sm:$0xff]  }
  0x51   :  { %v2835_v8 = vld [vmem:[#allocation5 + $0x60] ss:$16 sps:$4 sm:$0xff]   ;;  %v2836_v9 = vld [vmem:[#allocation5 + $0x84] ss:$16 sps:$4 sm:$0xff]   ;;  %v2884_v50 = vld [vmem:[#allocation5 + $0x8] ss:$16 sps:$4 sm:$0xff]  }
  0x52   :  { %v2838_v10 = vld [vmem:[#allocation5 + $0x80] ss:$16 sps:$4 sm:$0xff]   ;;  %v2839_v11 = vld [vmem:[#allocation5 + $0xa4] ss:$16 sps:$4 sm:$0xff]   ;;  %v2889_v52 = vld [vmem:[#allocation5 + $0x2c] ss:$16 sps:$4 sm:$0xff]  }
  0x53   :  { %613 = vmatpush1.bf16.msra.mxu1 %v2829_v4  ;;  %v2863_v12 = vld [vmem:[#allocation5 + $0x204] ss:$16 sps:$4 sm:$0xff]   ;;  %v2865_v13 = vld [vmem:[#allocation5 + $0x200] ss:$16 sps:$4 sm:$0xff]   ;;  %v2887_v53 = vld [vmem:[#allocation5 + $0x28] ss:$16 sps:$4 sm:$0xff]  }
  0x54   :  { %614 = vmatprep.subr.bf16.mxu1 %v2830_v5  ;;  %v2841_v14 = vld [vmem:[#allocation5 + $0xa0] ss:$16 sps:$4 sm:$0xff]   ;;  %v2842_v15 = vld [vmem:[#allocation5 + $0xc4] ss:$16 sps:$4 sm:$0xff]   ;;  %653 = vmatprep.subr.bf16.mxu0 %v2863_v12  ;;  %v2892_v54 = vld [vmem:[#allocation5 + $0x4c] ss:$16 sps:$4 sm:$0xff]  }
  0x55   :  { %v2869_v16 = vld [vmem:[#allocation5 + $0x224] ss:$16 sps:$4 sm:$0xff]   ;;  %654 = vmatpush1.bf16.msra.mxu0 %v2865_v13  ;;  %v2871_v17 = vld [vmem:[#allocation5 + $0x220] ss:$16 sps:$4 sm:$0xff]   ;;  %v2890_v55 = vld [vmem:[#allocation5 + $0x48] ss:$16 sps:$4 sm:$0xff]  }
  0x56   :  { %655 = vmatprep.subr.bf16.mxu0 %v2869_v16  ;;  %v2844_v18 = vld [vmem:[#allocation5 + $0xc0] ss:$16 sps:$4 sm:$0xff]   ;;  %v2875_v19 = vld [vmem:[#allocation5 + $0x244] ss:$16 sps:$4 sm:$0xff]   ;;  %v2895_v56 = vld [vmem:[#allocation5 + $0x6c] ss:$16 sps:$4 sm:$0xff]  }
  0x57   :  { %615 = vmatpush1.bf16.msra.mxu1 %v2832_v6  ;;  %v2845_v20 = vld [vmem:[#allocation5 + $0xe4] ss:$16 sps:$4 sm:$0xff]   ;;  %v2877_v21 = vld [vmem:[#allocation5 + $0x240] ss:$16 sps:$4 sm:$0xff]   ;;  %v2893_v57 = vld [vmem:[#allocation5 + $0x68] ss:$16 sps:$4 sm:$0xff]  }
  0x58   :  { %616 = vmatprep.subr.bf16.mxu1 %v2833_v7  ;;  %v2881_v22 = vld [vmem:[#allocation5 + $0x264] ss:$16 sps:$4 sm:$0xff]   ;;  %v2847_v25 = vld [vmem:[#allocation5 + $0xe0] ss:$16 sps:$4 sm:$0xff]   ;;  %v2898_v58 = vld [vmem:[#allocation5 + $0x8c] ss:$16 sps:$4 sm:$0xff]  }
  0x59   :  { %656 = vmatpush1.bf16.msra.mxu0 %v2871_v17  ;;  %v99_v24 = vld [vmem:[#allocation2 + $0x20] sm:$0xff]  ;;  %v97_v29 = vld [vmem:[#allocation2 + $0x10] sm:$0xff]  ;;  %v2896_v59 = vld [vmem:[#allocation5 + $0x88] ss:$16 sps:$4 sm:$0xff]  }
  0x5a   :  { %657 = vmatprep.subr.bf16.mxu0 %v2875_v19  ;;  %v102_v26 = vpack.c.bf16 %v99_v24, %v96_v23  ;;  %v2848_v27 = vld [vmem:[#allocation5 + $0x104] ss:$16 sps:$4 sm:$0xff]   ;;  %v2883_v28 = vld [vmem:[#allocation5 + $0x260] ss:$16 sps:$4 sm:$0xff]   ;;  %v3492_v33 = vpack.c.bf16 %v100_v30, %v97_v29  ;;  %v2901_v60 = vld [vmem:[#allocation5 + $0xac] ss:$16 sps:$4 sm:$0xff]  }
  0x5b   :  { %617 = vmatpush1.bf16.msra.mxu1 %v2835_v8  ;;  %v2850_v31 = vld [vmem:[#allocation5 + $0x100] ss:$16 sps:$4 sm:$0xff]   ;;  %v2851_v32 = vld [vmem:[#allocation5 + $0x124] ss:$16 sps:$4 sm:$0xff]   ;;  %v2899_v61 = vld [vmem:[#allocation5 + $0xa8] ss:$16 sps:$4 sm:$0xff]  }
  0x5c   :  { %618 = vmatprep.subr.bf16.mxu1 %v2836_v9  ;;  %642 = vmatprep.mubr.bf16.mxu1 %v102_v26  ;;  %v2853_v34 = vld [vmem:[#allocation5 + $0x120] ss:$16 sps:$4 sm:$0xff]   ;;  %v2854_v35 = vld [vmem:[#allocation5 + $0x144] ss:$16 sps:$4 sm:$0xff]   ;;  %v2904_v62 = vld [vmem:[#allocation5 + $0xcc] ss:$16 sps:$4 sm:$0xff]  }
  0x5d   :  { %658 = vmatpush1.bf16.msra.mxu0 %v2877_v21  ;;  %v2856_v36 = vld [vmem:[#allocation5 + $0x140] ss:$16 sps:$4 sm:$0xff]   ;;  %v2857_v37 = vld [vmem:[#allocation5 + $0x164] ss:$16 sps:$4 sm:$0xff]   ;;  %v2902_v63 = vld [vmem:[#allocation5 + $0xc8] ss:$16 sps:$4 sm:$0xff]  }
  0x5e   :  { %659 = vmatprep.subr.bf16.mxu0 %v2881_v22  ;;  %v2859_v38 = vld [vmem:[#allocation5 + $0x160] ss:$16 sps:$4 sm:$0xff]   ;;  %v2860_v39 = vld [vmem:[#allocation5 + $0x184] ss:$16 sps:$4 sm:$0xff]   ;;  %v2907_v1 = vld [vmem:[#allocation5 + $0xec] ss:$16 sps:$4 sm:$0xff]  }
  0x5f   :  { %619 = vmatpush1.bf16.msra.mxu1 %v2838_v10  ;;  %v2862_v40 = vld [vmem:[#allocation5 + $0x180] ss:$16 sps:$4 sm:$0xff]   ;;  %v2866_v41 = vld [vmem:[#allocation5 + $0x1a4] ss:$16 sps:$4 sm:$0xff]   ;;  %v2905_v2 = vld [vmem:[#allocation5 + $0xe8] ss:$16 sps:$4 sm:$0xff]  }
  0x60   :  { %620 = vmatprep.subr.bf16.mxu1 %v2839_v11  ;;  %v2868_v42 = vld [vmem:[#allocation5 + $0x1a0] ss:$16 sps:$4 sm:$0xff]   ;;  %v2872_v43 = vld [vmem:[#allocation5 + $0x1c4] ss:$16 sps:$4 sm:$0xff]   ;;  %v2910_v3 = vld [vmem:[#allocation5 + $0x10c] ss:$16 sps:$4 sm:$0xff]  }
  0x61   :  { %660 = vmatpush1.bf16.msra.mxu0 %v2883_v28  ;;  %v2874_v44 = vld [vmem:[#allocation5 + $0x1c0] ss:$16 sps:$4 sm:$0xff]   ;;  %v2878_v45 = vld [vmem:[#allocation5 + $0x1e4] ss:$16 sps:$4 sm:$0xff]   ;;  %v2908_v4 = vld [vmem:[#allocation5 + $0x108] ss:$16 sps:$4 sm:$0xff]  }
  0x62   :  { %v2880_v46 = vld [vmem:[#allocation5 + $0x1e0] ss:$16 sps:$4 sm:$0xff]   ;;  %v2913_v5 = vld [vmem:[#allocation5 + $0x12c] ss:$16 sps:$4 sm:$0xff]   ;;  %v2911_v6 = vld [vmem:[#allocation5 + $0x128] ss:$16 sps:$4 sm:$0xff]  }
  0x63   :  { %621 = vmatpush1.bf16.msra.mxu1 %v2841_v14  ;;  %v95_v47 = vld [vmem:[#allocation2] sm:$0xff]  ;;  %v2916_v7 = vld [vmem:[#allocation5 + $0x14c] ss:$16 sps:$4 sm:$0xff]   ;;  %v2914_v8 = vld [vmem:[#allocation5 + $0x148] ss:$16 sps:$4 sm:$0xff]  }
  0x64   :  { %622 = vmatprep.subr.bf16.mxu1 %v2842_v15  ;;  %2578 = vmatmul.mubr.msk.bf16.vlgmr.msra.gmra.mrb[0].mxu0 %vm606_vm0, %v3492_v33  ;;  %v3496_v51 = vpack.c.bf16 %v98_v48, %v95_v47  ;;  %v2919_v9 = vld [vmem:[#allocation5 + $0x16c] ss:$16 sps:$4 sm:$0xff]   ;;  %v2917_v10 = vld [vmem:[#allocation5 + $0x168] ss:$16 sps:$4 sm:$0xff]  }
  0x65   :  { %v2922_v11 = vld [vmem:[#allocation5 + $0x18c] ss:$16 sps:$4 sm:$0xff]   ;;  %v2920_v12 = vld [vmem:[#allocation5 + $0x188] ss:$16 sps:$4 sm:$0xff]  }
  0x66   :  { %v2925_v13 = vld [vmem:[#allocation5 + $0x1ac] ss:$16 sps:$4 sm:$0xff]   ;;  %v2923_v14 = vld [vmem:[#allocation5 + $0x1a8] ss:$16 sps:$4 sm:$0xff]  }
  0x67   :  { %623 = vmatpush1.bf16.msra.mxu1 %v2844_v18  ;;  %v2928_v15 = vld [vmem:[#allocation5 + $0x1cc] ss:$16 sps:$4 sm:$0xff]   ;;  %v2926_v16 = vld [vmem:[#allocation5 + $0x1c8] ss:$16 sps:$4 sm:$0xff]  }
  0x68   :  { %624 = vmatprep.subr.bf16.mxu1 %v2845_v20  ;;  %v2931_v17 = vld [vmem:[#allocation5 + $0x1ec] ss:$16 sps:$4 sm:$0xff]   ;;  %v2929_v18 = vld [vmem:[#allocation5 + $0x1e8] ss:$16 sps:$4 sm:$0xff]  }
  0x69   :  { %v2934_v19 = vld [vmem:[#allocation5 + $0x20c] ss:$16 sps:$4 sm:$0xff]   ;;  %v2932_v20 = vld [vmem:[#allocation5 + $0x208] ss:$16 sps:$4 sm:$0xff]  }
  0x6a   :  { %v2937_v21 = vld [vmem:[#allocation5 + $0x22c] ss:$16 sps:$4 sm:$0xff]   ;;  %v2935_v22 = vld [vmem:[#allocation5 + $0x228] ss:$16 sps:$4 sm:$0xff]  }
  0x6b   :  { %625 = vmatpush1.bf16.msra.mxu1 %v2847_v25  ;;  %v2940_v23 = vld [vmem:[#allocation5 + $0x24c] ss:$16 sps:$4 sm:$0xff]   ;;  %v2938_v24 = vld [vmem:[#allocation5 + $0x248] ss:$16 sps:$4 sm:$0xff]  }
  0x6c   :  { %626 = vmatprep.subr.bf16.mxu1 %v2848_v27  ;;  %v2943_v25 = vld [vmem:[#allocation5 + $0x26c] ss:$16 sps:$4 sm:$0xff]  }
  0x6f   :  { %627 = vmatpush1.bf16.msra.mxu1 %v2850_v31  ;;  %v186_v31 = vlaneseq }
  0x70   :  { %628 = vmatprep.subr.bf16.mxu1 %v2851_v32 }
  0x71   :  { %v187_v32 = vshrl.u32 %v186_v31, 7  ;;  %v2983_v31 = vld [vmem:[#allocation7 + $0xc8] ss:$16 sps:$4 sm:$0xff]  }
  0x73   :  { %629 = vmatpush1.bf16.msra.mxu1 %v2853_v34  ;;  %v184_v34 = vld [vmem:[%s3706_s2] sm:$0xf] }
  0x74   :  { %630 = vmatprep.subr.bf16.mxu1 %v2854_v35  ;;  %v3508_v35 = vsub.s32 1, %v187_v32 }
  0x77   :  { %631 = vmatpush1.bf16.msra.mxu1 %v2856_v36 }
  0x78   :  { %632 = vmatprep.subr.bf16.mxu1 %v2857_v37  ;;  %v193_v37 = vrot.slane %v184_v34, %v3508_v35 }
  0x7b   :  { %633 = vmatpush1.bf16.msra.mxu1 %v2859_v38 }
  0x7c   :  { %634 = vmatprep.subr.bf16.mxu1 %v2860_v39 }
  0x7f   :  { %635 = vmatpush1.bf16.msra.mxu1 %v2862_v40 }
  0x80   :  { %636 = vmatprep.subr.bf16.mxu1 %v2866_v41 }
  0x83   :  { %637 = vmatpush1.bf16.msra.mxu1 %v2868_v42 }
  0x84   :  { %638 = vmatprep.subr.bf16.mxu1 %v2872_v43 }
  0x87   :  { %639 = vmatpush1.bf16.msra.mxu1 %v2874_v44 }
  0x88   :  { %640 = vmatprep.subr.bf16.mxu1 %v2878_v45 }
  0x8b   :  { %641 = vmatpush1.bf16.msra.mxu1 %v2880_v46 }
  0x8c   :  { %696 = vmatprep.subr.bf16.mxu1 %v2886_v49  ;;  %v3520_v49 = vsub.s32 2, %v187_v32 }
  0x8e   :  { %643 = vmatmul.mubr.bf16.vlgmr.msra.gmra.mrb[0].mxu1 %v3496_v51 }
  0x8f   :  { %697 = vmatpush1.bf16.msra.mxu1 %v2884_v50  ;;  %728 = vmatprep.mubr.bf16.mxu1 %v102_v26  ;;  %v2941_v26 = vld [vmem:[#allocation5 + $0x268] ss:$16 sps:$4 sm:$0xff]   ;;  %v3522_v50 = vsub.s32 3, %v187_v32 }
  0x90   :  { %698 = vmatprep.subr.bf16.mxu1 %v2889_v52 }
  0x91   :  { %v201_v52 = vrot.slane %v184_v34, %v3522_v50 }
  0x93   :  { %699 = vmatpush1.bf16.msra.mxu1 %v2887_v53 }
  0x94   :  { %700 = vmatprep.subr.bf16.mxu1 %v2892_v54 }
  0x97   :  { %701 = vmatpush1.bf16.msra.mxu1 %v2890_v55 }
  0x98   :  { %702 = vmatprep.subr.bf16.mxu1 %v2895_v56 }
  0x9b   :  { %703 = vmatpush1.bf16.msra.mxu1 %v2893_v57 }
  0x9c   :  { %704 = vmatprep.subr.bf16.mxu1 %v2898_v58 }
  0x9f   :  { %705 = vmatpush1.bf16.msra.mxu1 %v2896_v59 }
  0xa0   :  { %706 = vmatprep.subr.bf16.mxu1 %v2901_v60 }
  0xa3   :  { %707 = vmatpush1.bf16.msra.mxu1 %v2899_v61 }
  0xa4   :  { %708 = vmatprep.subr.bf16.mxu1 %v2904_v62 }
  0xa7   :  { %709 = vmatpush1.bf16.msra.mxu1 %v2902_v63 }
  0xa8   :  { %710 = vmatprep.subr.bf16.mxu1 %v2907_v1 }
  0xab   :  { %711 = vmatpush1.bf16.msra.mxu1 %v2905_v2 }
  0xac   :  { %712 = vmatprep.subr.bf16.mxu1 %v2910_v3 }
  0xaf   :  { %713 = vmatpush1.bf16.msra.mxu1 %v2908_v4  ;;  %v2944_v4 = vld [vmem:[#allocation7] ss:$16 sps:$4 sm:$0xff]  }
  0xb0   :  { %714 = vmatprep.subr.bf16.mxu1 %v2913_v5  ;;  %v2946_v5 = vld [vmem:[#allocation7 + $0x4] ss:$16 sps:$4 sm:$0xff]  }
  0xb1   :  { %1697 = vmatprep.subr.bf16.mxu0 %v2946_v5 }
  0xb2   :  { %1698 = vmatpush1.bf16.msra.mxu0 %v2944_v4 }
  0xb3   :  { %715 = vmatpush1.bf16.msra.mxu1 %v2911_v6  ;;  %v2947_v6 = vld [vmem:[#allocation7 + $0x8] ss:$16 sps:$4 sm:$0xff]  }
  0xb4   :  { %716 = vmatprep.subr.bf16.mxu1 %v2916_v7  ;;  %v2949_v7 = vld [vmem:[#allocation7 + $0xc] ss:$16 sps:$4 sm:$0xff]  }
  0xb7   :  { %717 = vmatpush1.bf16.msra.mxu1 %v2914_v8  ;;  %v2952_v8 = vld [vmem:[#allocation7 + $0x24] ss:$16 sps:$4 sm:$0xff]  }
  0xb8   :  { %718 = vmatprep.subr.bf16.mxu1 %v2919_v9  ;;  %v2955_v9 = vld [vmem:[#allocation7 + $0x2c] ss:$16 sps:$4 sm:$0xff]   ;;  %1699 = vmatprep.subr.bf16.mxu0 %v2952_v8  ;;  %v2998_v8 = vld [vmem:[#allocation7 + $0x120] ss:$16 sps:$4 sm:$0xff]  }
  0xbb   :  { %719 = vmatpush1.bf16.msra.mxu1 %v2917_v10  ;;  %v2950_v10 = vld [vmem:[#allocation7 + $0x20] ss:$16 sps:$4 sm:$0xff]  }
  0xbc   :  { %720 = vmatprep.subr.bf16.mxu1 %v2922_v11  ;;  %v2953_v11 = vld [vmem:[#allocation7 + $0x28] ss:$16 sps:$4 sm:$0xff]   ;;  %1700 = vmatpush1.bf16.msra.mxu0 %v2950_v10  ;;  %v3006_v10 = vld [vmem:[#allocation7 + $0x144] ss:$16 sps:$4 sm:$0xff]  }
  0xbf   :  { %721 = vmatpush1.bf16.msra.mxu1 %v2920_v12  ;;  %v2958_v12 = vld [vmem:[#allocation7 + $0x44] ss:$16 sps:$4 sm:$0xff]  }
  0xc0   :  { %722 = vmatprep.subr.bf16.mxu1 %v2925_v13  ;;  %v2961_v13 = vld [vmem:[#allocation7 + $0x4c] ss:$16 sps:$4 sm:$0xff]   ;;  %1701 = vmatprep.subr.bf16.mxu0 %v2958_v12  ;;  %v3004_v12 = vld [vmem:[#allocation7 + $0x140] ss:$16 sps:$4 sm:$0xff]  }
  0xc3   :  { %723 = vmatpush1.bf16.msra.mxu1 %v2923_v14  ;;  %v2956_v14 = vld [vmem:[#allocation7 + $0x40] ss:$16 sps:$4 sm:$0xff]  }
  0xc4   :  { %724 = vmatprep.subr.bf16.mxu1 %v2928_v15  ;;  %v2959_v15 = vld [vmem:[#allocation7 + $0x48] ss:$16 sps:$4 sm:$0xff]   ;;  %1702 = vmatpush1.bf16.msra.mxu0 %v2956_v14  ;;  %v3010_v14 = vld [vmem:[#allocation7 + $0x160] ss:$16 sps:$4 sm:$0xff]  }
  0xc7   :  { %725 = vmatpush1.bf16.msra.mxu1 %v2926_v16  ;;  %v2964_v16 = vld [vmem:[#allocation7 + $0x64] ss:$16 sps:$4 sm:$0xff]  }
  0xc8   :  { %726 = vmatprep.subr.bf16.mxu1 %v2931_v17  ;;  %v2967_v17 = vld [vmem:[#allocation7 + $0x6c] ss:$16 sps:$4 sm:$0xff]   ;;  %1703 = vmatprep.subr.bf16.mxu0 %v2964_v16  ;;  %v3013_v16 = vld [vmem:[#allocation7 + $0x168] ss:$16 sps:$4 sm:$0xff]  }
  0xcb   :  { %727 = vmatpush1.bf16.msra.mxu1 %v2929_v18  ;;  %v2962_v18 = vld [vmem:[#allocation7 + $0x60] ss:$16 sps:$4 sm:$0xff]  }
  0xcc   :  { %739 = vmatprep.subr.bf16.mxu1 %v2934_v19  ;;  %v2965_v19 = vld [vmem:[#allocation7 + $0x68] ss:$16 sps:$4 sm:$0xff]   ;;  %1704 = vmatpush1.bf16.msra.mxu0 %v2962_v18  ;;  %v3018_v18 = vld [vmem:[#allocation7 + $0x184] ss:$16 sps:$4 sm:$0xff]  }
  0xce   :  { %729 = vmatmul.mubr.bf16.vlgmr.msra.gmra.mrb[4].mxu1 %v3496_v51  ;;  %v197_v51 = vrot.slane %v184_v34, %v3520_v49 }
  0xcf   :  { %740 = vmatpush1.bf16.msra.mxu1 %v2932_v20  ;;  %771 = vmatprep.mubr.bf16.mxu1 %v3368_v0  ;;  %v3503_v0 = vsub.s32 0, %v187_v32  ;;  %v2970_v20 = vld [vmem:[#allocation7 + $0x84] ss:$16 sps:$4 sm:$0xff]  }
  0xd0   :  { %741 = vmatprep.subr.bf16.mxu1 %v2937_v21  ;;  %v2973_v21 = vld [vmem:[#allocation7 + $0x8c] ss:$16 sps:$4 sm:$0xff]   ;;  %1705 = vmatprep.subr.bf16.mxu0 %v2970_v20  ;;  %v2988_v32 = vld [vmem:[#allocation7 + $0xe4] ss:$16 sps:$4 sm:$0xff]   ;;  %v3016_v20 = vld [vmem:[#allocation7 + $0x180] ss:$16 sps:$4 sm:$0xff]  }
  0xd1   :  { %v189_v36 = vrot.slane %v184_v34, %v3503_v0  ;;  %v2991_v34 = vld [vmem:[#allocation7 + $0xec] ss:$16 sps:$4 sm:$0xff]  }
  0xd3   :  { %742 = vmatpush1.bf16.msra.mxu1 %v2935_v22  ;;  %v2968_v22 = vld [vmem:[#allocation7 + $0x80] ss:$16 sps:$4 sm:$0xff]  }
  0xd4   :  { %743 = vmatprep.subr.bf16.mxu1 %v2940_v23  ;;  %v2971_v23 = vld [vmem:[#allocation7 + $0x88] ss:$16 sps:$4 sm:$0xff]   ;;  %1706 = vmatpush1.bf16.msra.mxu0 %v2968_v22  ;;  %v3024_v22 = vld [vmem:[#allocation7 + $0x1a4] ss:$16 sps:$4 sm:$0xff]  }
  0xd7   :  { %744 = vmatpush1.bf16.msra.mxu1 %v2938_v24  ;;  %v2976_v24 = vld [vmem:[#allocation7 + $0xa4] ss:$16 sps:$4 sm:$0xff]  }
  0xd8   :  { %745 = vmatprep.subr.bf16.mxu1 %v2943_v25  ;;  %v2979_v25 = vld [vmem:[#allocation7 + $0xac] ss:$16 sps:$4 sm:$0xff]   ;;  %1707 = vmatprep.subr.bf16.mxu0 %v2976_v24  ;;  %v3022_v24 = vld [vmem:[#allocation7 + $0x1a0] ss:$16 sps:$4 sm:$0xff]  }
  0xdb   :  { %746 = vmatpush1.bf16.msra.mxu1 %v2941_v26  ;;  %v2974_v26 = vld [vmem:[#allocation7 + $0xa0] ss:$16 sps:$4 sm:$0xff]  }
  0xdc   :  { %1783 = vmatprep.subr.bf16.mxu1 %v2949_v7  ;;  %1708 = vmatpush1.bf16.msra.mxu0 %v2974_v26  ;;  %v3003_v7 = vld [vmem:[#allocation7 + $0x12c] ss:$16 sps:$4 sm:$0xff]   ;;  %v3030_v26 = vld [vmem:[#allocation7 + $0x1c4] ss:$16 sps:$4 sm:$0xff]  }
  0xde   :  { %2579 = vmatmul.mubr.msk.bf16.vlgmr.msra.gmra.mrb[4].mxu1 %vm606_vm0, %v3492_v33 }
  0xdf   :  { %1784 = vmatpush1.bf16.msra.mxu1 %v2947_v6 }
  0xe0   :  { %1785 = vmatprep.subr.bf16.mxu1 %v2955_v9  ;;  %v3001_v9 = vld [vmem:[#allocation7 + $0x128] ss:$16 sps:$4 sm:$0xff]  }
  0xe3   :  { %1786 = vmatpush1.bf16.msra.mxu1 %v2953_v11  ;;  %v3009_v11 = vld [vmem:[#allocation7 + $0x14c] ss:$16 sps:$4 sm:$0xff]  }
  0xe4   :  { %1787 = vmatprep.subr.bf16.mxu1 %v2961_v13  ;;  %v3007_v13 = vld [vmem:[#allocation7 + $0x148] ss:$16 sps:$4 sm:$0xff]  }
  0xe7   :  { %1788 = vmatpush1.bf16.msra.mxu1 %v2959_v15  ;;  %v3012_v15 = vld [vmem:[#allocation7 + $0x164] ss:$16 sps:$4 sm:$0xff]  }
  0xe8   :  { %1789 = vmatprep.subr.bf16.mxu1 %v2967_v17  ;;  %v3015_v17 = vld [vmem:[#allocation7 + $0x16c] ss:$16 sps:$4 sm:$0xff]  }
  0xeb   :  { %1790 = vmatpush1.bf16.msra.mxu1 %v2965_v19  ;;  %v3021_v19 = vld [vmem:[#allocation7 + $0x18c] ss:$16 sps:$4 sm:$0xff]  }
  0xec   :  { %1791 = vmatprep.subr.bf16.mxu1 %v2973_v21  ;;  %v3019_v21 = vld [vmem:[#allocation7 + $0x188] ss:$16 sps:$4 sm:$0xff]  }
  0xef   :  { %1792 = vmatpush1.bf16.msra.mxu1 %v2971_v23  ;;  %v3027_v23 = vld [vmem:[#allocation7 + $0x1ac] ss:$16 sps:$4 sm:$0xff]  }
  0xf0   :  { %1793 = vmatprep.subr.bf16.mxu1 %v2979_v25  ;;  %v3025_v25 = vld [vmem:[#allocation7 + $0x1a8] ss:$16 sps:$4 sm:$0xff]  }
 0x137   :  { %v687_v27 = vpop.f32.mrb[0].mxu0 }
 0x138   :  { %v689_v28 = vpop.f32.mrb[1].mxu0 }
 0x139   :  { %v691_v29 = vpop.f32.mrb[2].mxu0 }
 0x13a   :  { %v693_v30 = vpop.f32.mrb[3].mxu0 }
 0x161   :  { %v644_v38 = vpop.f32.mrb[0].mxu1 }
 0x162   :  { %v645_v33 = vadd.f32 %v644_v38, %v189_v36  ;;  %v646_v39 = vpop.f32.mrb[1].mxu1  ;;  %v2994_v38 = vld [vmem:[#allocation7 + $0x104] ss:$16 sps:$4 sm:$0xff]  }
 0x163   :  { %v647_v40 = vadd.f32 %v646_v39, %v193_v37  ;;  %v648_v41 = vpop.f32.mrb[2].mxu1  ;;  %v2992_v39 = vld [vmem:[#allocation7 + $0x100] ss:$16 sps:$4 sm:$0xff]  }
 0x164   :  { %v649_v42 = vadd.f32 %v648_v41, %v189_v36  ;;  %v3512_v43 = vadd.f32 %v687_v27, %v645_v33  ;;  %v650_v44 = vpop.f32.mrb[3].mxu1  ;;  %v2977_v27 = vld [vmem:[#allocation7 + $0xa8] ss:$16 sps:$4 sm:$0xff]   ;;  %v2986_v36 = vld [vmem:[#allocation7 + $0xe0] ss:$16 sps:$4 sm:$0xff]  }
 0x165   :  { %v651_v45 = vadd.f32 %v650_v44, %v193_v37  ;;  %v3514_v46 = vadd.f32 %v689_v28, %v647_v40  ;;  %v2982_v28 = vld [vmem:[#allocation7 + $0xc4] ss:$16 sps:$4 sm:$0xff]   ;;  %1794 = vmatpush1.bf16.msra.mxu1 %v2977_v27  ;;  %v2989_v37 = vld [vmem:[#allocation7 + $0xe8] ss:$16 sps:$4 sm:$0xff]   ;;  %v2997_v33 = vld [vmem:[#allocation7 + $0x10c] ss:$16 sps:$4 sm:$0xff]  }
 0x166   :  { %v3516_v47 = vadd.f32 %v691_v29, %v649_v42  ;;  %v2985_v29 = vld [vmem:[#allocation7 + $0xcc] ss:$16 sps:$4 sm:$0xff]   ;;  %1709 = vmatprep.subr.bf16.mxu0 %v2982_v28  ;;  %v2995_v40 = vld [vmem:[#allocation7 + $0x108] ss:$16 sps:$4 sm:$0xff]   ;;  %v3028_v28 = vld [vmem:[#allocation7 + $0x1c0] ss:$16 sps:$4 sm:$0xff]  }
 0x167   :  { %v3518_v48 = vadd.f32 %v693_v30, %v651_v45  ;;  %v784_v54 = vadd.f32 %v3514_v46, %v3512_v43  ;;  %v2980_v30 = vld [vmem:[#allocation7 + $0xc0] ss:$16 sps:$4 sm:$0xff]   ;;  %1795 = vmatprep.subr.bf16.mxu1 %v2985_v29  ;;  %v3033_v27 = vld [vmem:[#allocation7 + $0x1cc] ss:$16 sps:$4 sm:$0xff]   ;;  %v3031_v29 = vld [vmem:[#allocation7 + $0x1c8] ss:$16 sps:$4 sm:$0xff]  }
 0x168   :  { %1710 = vmatpush1.bf16.msra.mxu0 %v2980_v30  ;;  %v3036_v30 = vld [vmem:[#allocation7 + $0x1e4] ss:$16 sps:$4 sm:$0xff]  }
 0x169   :  { %v789_v59 = vadd.f32 %v3518_v48, %v3516_v47  ;;  %1796 = vmatpush1.bf16.msra.mxu1 %v2983_v31  ;;  %1711 = vmatprep.subr.bf16.mxu0 %v2988_v32  ;;  %v3039_v31 = vld [vmem:[#allocation7 + $0x1ec] ss:$16 sps:$4 sm:$0xff]   ;;  %v3034_v32 = vld [vmem:[#allocation7 + $0x1e0] ss:$16 sps:$4 sm:$0xff]  }
 0x16a   :  { %1797 = vmatprep.subr.bf16.mxu1 %v2991_v34  ;;  %v3037_v34 = vld [vmem:[#allocation7 + $0x1e8] ss:$16 sps:$4 sm:$0xff]  }
 0x16c   :  { %1712 = vmatpush1.bf16.msra.mxu0 %v2986_v36  ;;  %v3042_v36 = vld [vmem:[#allocation7 + $0x204] ss:$16 sps:$4 sm:$0xff]  }
 0x16d   :  { %1798 = vmatpush1.bf16.msra.mxu1 %v2989_v37  ;;  %1713 = vmatprep.subr.bf16.mxu0 %v2994_v38  ;;  %v3045_v37 = vld [vmem:[#allocation7 + $0x20c] ss:$16 sps:$4 sm:$0xff]  }
 0x16e   :  { %1799 = vmatprep.subr.bf16.mxu1 %v2997_v33 }
 0x170   :  { %1714 = vmatpush1.bf16.msra.mxu0 %v2992_v39 }
 0x171   :  { %1800 = vmatpush1.bf16.msra.mxu1 %v2995_v40 }
 0x172   :  { %1801 = vmatprep.subr.bf16.mxu1 %v3003_v7 }
 0x175   :  { %1802 = vmatpush1.bf16.msra.mxu1 %v3001_v9 }
 0x176   :  { %1803 = vmatprep.subr.bf16.mxu1 %v3009_v11 }
 0x179   :  { %1804 = vmatpush1.bf16.msra.mxu1 %v3007_v13 }
 0x17a   :  { %1805 = vmatprep.subr.bf16.mxu1 %v3015_v17 }
 0x17d   :  { %1806 = vmatpush1.bf16.msra.mxu1 %v3013_v16 }
 0x17e   :  { %1807 = vmatprep.subr.bf16.mxu1 %v3021_v19 }
 0x181   :  { %1808 = vmatpush1.bf16.msra.mxu1 %v3019_v21 }
 0x182   :  { %1809 = vmatprep.subr.bf16.mxu1 %v3027_v23 }
 0x185   :  { %1810 = vmatpush1.bf16.msra.mxu1 %v3025_v25 }
 0x186   :  { %1811 = vmatprep.subr.bf16.mxu1 %v3033_v27  ;;  %v3043_v27 = vld [vmem:[#allocation7 + $0x208] ss:$16 sps:$4 sm:$0xff]  }
 0x189   :  { %1812 = vmatpush1.bf16.msra.mxu1 %v3031_v29 }
 0x18a   :  { %1813 = vmatprep.subr.bf16.mxu1 %v3039_v31  ;;  %v3048_v31 = vld [vmem:[#allocation7 + $0x224] ss:$16 sps:$4 sm:$0xff]  }
 0x18d   :  { %1814 = vmatpush1.bf16.msra.mxu1 %v3037_v34 }
 0x18e   :  { %1826 = vmatprep.subr.bf16.mxu1 %v3045_v37  ;;  %v3049_v37 = vld [vmem:[#allocation7 + $0x228] ss:$16 sps:$4 sm:$0xff]  }
 0x1b1   :  { %v773_v53 = vpop.f32.mrb[4].mxu1 }
 0x1b2   :  { %v3528_v55 = vadd.f32 %v773_v53, %v197_v51  ;;  %v775_v56 = vpop.f32.mrb[5].mxu1 }
 0x1b3   :  { %v3530_v57 = vadd.f32 %v775_v56, %v201_v52  ;;  %v777_v58 = vpop.f32.mrb[6].mxu1 }
 0x1b4   :  { %v3534_v60 = vadd.f32 %v777_v58, %v197_v51  ;;  %v779_v61 = vpop.f32.mrb[7].mxu1  ;;  %v785_v62 = vadd.f32 %v3528_v55, %v784_v54 }
 0x1b5   :  { %v3538_v1 = vadd.f32 %v779_v61, %v201_v52 }
 0x1b6   :  { %v790_v63 = vadd.f32 %v3534_v60, %v789_v59  ;;  %v786_v2 = vadd.f32 %v3530_v57, %v785_v62 }
 0x1b8   :  { %787 = vadd.xlane.f32.xlu0 %v786_v2  ;;  %v791_v3 = vadd.f32 %v3538_v1, %v790_v63 }
 0x1bc   :  { %792 = vadd.xlane.f32.xlu0 %v791_v3 }
 0x245   :  { %v788_v41 = vpop.xlane.xlu0 %787 }
 0x246   :  { %v795_v42 = vmul.f32 0.001953125, %v788_v41 }
 0x248   :  { %v3543_v44 = vsub.f32 %v3512_v43, %v795_v42  ;;  %v3546_v45 = vsub.f32 %v3514_v46, %v795_v42  ;;  %v3549_v51 = vsub.f32 %v3528_v55, %v795_v42  ;;  %v3552_v53 = vsub.f32 %v3530_v57, %v795_v42 }
 0x249   :  { %v793_v52 = vpop.xlane.xlu0 %792 }
 0x24a   :  { %v796_v54 = vmul.f32 0.001953125, %v793_v52  ;;  %v805_v56 = vmul.f32 %v3543_v44, %v3543_v44  ;;  %v806_v58 = vmul.f32 %v3546_v45, %v3546_v45  ;;  %v807_v43 = vmul.f32 %v3549_v51, %v3549_v51  ;;  %v782_v52 = vld [vmem:[%s3707_s3] sm:$0xf] }
 0x24b   :  { %v808_v61 = vmul.f32 %v3552_v53, %v3552_v53 }
 0x24c   :  { %v3561_v46 = vsub.f32 %v3516_v47, %v796_v54  ;;  %v3564_v55 = vsub.f32 %v3518_v48, %v796_v54  ;;  %v813_v59 = vadd.f32 %v806_v58, %v805_v56  ;;  %v3567_v57 = vsub.f32 %v3534_v60, %v796_v54 }
 0x24d   :  { %v3572_v63 = vsub.f32 %v3538_v1, %v796_v54  ;;  %v3000_v1 = vld [vmem:[#allocation7 + $0x124] ss:$16 sps:$4 sm:$0xff]   ;;  %v783_v54 = vld [vmem:[%s3708_s4] sm:$0xf]  ;;  %v845_v56 = vrot.slane %v782_v52, %v3508_v35  ;;  %v841_v58 = vrot.slane %v782_v52, %v3503_v0 }
 0x24e   :  { %v814_v62 = vadd.f32 %v813_v59, %v807_v43  ;;  %v809_v2 = vmul.f32 %v3561_v46, %v3561_v46  ;;  %v810_v47 = vmul.f32 %v3564_v55, %v3564_v55  ;;  %v811_v48 = vmul.f32 %v3567_v57, %v3567_v57  ;;  %1715 = vmatprep.subr.bf16.mxu0 %v3000_v1 }
 0x24f   :  { %v812_v60 = vmul.f32 %v3572_v63, %v3572_v63  ;;  %1716 = vmatpush1.bf16.msra.mxu0 %v2998_v8  ;;  %v849_v43 = vrot.slane %v782_v52, %v3520_v49 }
 0x250   :  { %v815_v3 = vadd.f32 %v814_v62, %v808_v61  ;;  %v818_v4 = vadd.f32 %v810_v47, %v809_v2  ;;  %1717 = vmatprep.subr.bf16.mxu0 %v3006_v10  ;;  %v874_v47 = vrot.slane %v783_v54, %v3508_v35 }
 0x252   :  { %816 = vadd.xlane.f32.xlu1 %v815_v3  ;;  %v819_v5 = vadd.f32 %v818_v4, %v811_v48  ;;  %v853_v48 = vrot.slane %v782_v52, %v3522_v50  ;;  %v878_v4 = vrot.slane %v783_v54, %v3520_v49  ;;  %v3058_v52 = vld [vmem:[#allocation7 + $0x260] ss:$16 sps:$4 sm:$0xff]  }
 0x253   :  { %1718 = vmatpush1.bf16.msra.mxu0 %v3004_v12 }
 0x254   :  { %v820_v6 = vadd.f32 %v819_v5, %v812_v60  ;;  %1719 = vmatprep.subr.bf16.mxu0 %v3012_v15 }
 0x256   :  { %821 = vadd.xlane.f32.xlu1 %v820_v6  ;;  %v870_v6 = vrot.slane %v783_v54, %v3503_v0 }
 0x257   :  { %1720 = vmatpush1.bf16.msra.mxu0 %v3010_v14 }
 0x258   :  { %1721 = vmatprep.subr.bf16.mxu0 %v3018_v18 }
 0x25b   :  { %1722 = vmatpush1.bf16.msra.mxu0 %v3016_v20 }
 0x25c   :  { %1723 = vmatprep.subr.bf16.mxu0 %v3024_v22 }
 0x25f   :  { %1724 = vmatpush1.bf16.msra.mxu0 %v3022_v24 }
 0x260   :  { %1725 = vmatprep.subr.bf16.mxu0 %v3030_v26  ;;  %v3040_v26 = vld [vmem:[#allocation7 + $0x200] ss:$16 sps:$4 sm:$0xff]  }
 0x263   :  { %1726 = vmatpush1.bf16.msra.mxu0 %v3028_v28 }
 0x264   :  { %1727 = vmatprep.subr.bf16.mxu0 %v3036_v30 }
 0x267   :  { %1728 = vmatpush1.bf16.msra.mxu0 %v3034_v32  ;;  %v3051_v32 = vld [vmem:[#allocation7 + $0x22c] ss:$16 sps:$4 sm:$0xff]  }
 0x268   :  { %1740 = vmatprep.subr.bf16.mxu0 %v3042_v36  ;;  %v3046_v36 = vld [vmem:[#allocation7 + $0x220] ss:$16 sps:$4 sm:$0xff]  }
 0x2df   :  { %v817_v38 = vpop.xlane.xlu1 %816 }
 0x2e0   :  { %v823_v33 = vmul.f32 0.001953125, %v817_v38  ;;  %v3054_v38 = vld [vmem:[#allocation7 + $0x244] ss:$16 sps:$4 sm:$0xff]  }
 0x2e2   :  { %v825_v39 = vadd.f32 1e-05, %v823_v33  ;;  %v3057_v33 = vld [vmem:[#allocation7 + $0x24c] ss:$16 sps:$4 sm:$0xff]  }
 0x2e3   :  { %v822_v40 = vpop.xlane.xlu1 %821 }
 0x2e4   :  { %3232 = vrsqrt.f32 %v825_v39  ;;  %v824_v41 = vmul.f32 0.001953125, %v822_v40  ;;  %v3052_v39 = vld [vmem:[#allocation7 + $0x240] ss:$16 sps:$4 sm:$0xff]   ;;  %v3055_v40 = vld [vmem:[#allocation7 + $0x248] ss:$16 sps:$4 sm:$0xff]  }
 0x2e6   :  { %v826_v42 = vadd.f32 1e-05, %v824_v41  ;;  %v3060_v41 = vld [vmem:[#allocation7 + $0x264] ss:$16 sps:$4 sm:$0xff]  }
 0x2e8   :  { %3234 = vrsqrt.f32 %v826_v42  ;;  %v3063_v42 = vld [vmem:[#allocation7 + $0x26c] ss:$16 sps:$4 sm:$0xff]  }
 0x2ee   :  { %v3233_v59 = vpop.eup %3232 }
 0x2ef   :  { %v830_v61 = vmul.f32 %v3233_v59, %v3546_v45  ;;  %v829_v62 = vmul.f32 %v3233_v59, %v3543_v44  ;;  %v831_v2 = vmul.f32 %v3233_v59, %v3549_v51  ;;  %v832_v3 = vmul.f32 %v3233_v59, %v3552_v53  ;;  %v3067_v59 = vld [vmem:[#allocation7 + $0x288] ss:$16 sps:$4 sm:$0xff]  }
 0x2f0   :  { %v882_v51 = vrot.slane %v783_v54, %v3522_v50  ;;  %v3061_v54 = vld [vmem:[#allocation7 + $0x268] ss:$16 sps:$4 sm:$0xff]  }
 0x2f1   :  { %v859_v60 = vmul.f32 %v845_v56, %v830_v61  ;;  %v858_v5 = vmul.f32 %v841_v58, %v829_v62  ;;  %v860_v1 = vmul.f32 %v849_v43, %v831_v2  ;;  %v861_v9 = vmul.f32 %v853_v48, %v832_v3  ;;  %v3072_v61 = vld [vmem:[#allocation7 + $0x2a4] ss:$16 sps:$4 sm:$0xff]   ;;  %v3075_v62 = vld [vmem:[#allocation7 + $0x2ac] ss:$16 sps:$4 sm:$0xff]   ;;  %v3070_v2 = vld [vmem:[#allocation7 + $0x2a0] ss:$16 sps:$4 sm:$0xff]  }
 0x2f2   :  { %v3235_v7 = vpop.eup %3234  ;;  %v3078_v3 = vld [vmem:[#allocation7 + $0x2c4] ss:$16 sps:$4 sm:$0xff]  }
 0x2f3   :  { %v834_v45 = vmul.f32 %v3235_v7, %v3564_v55  ;;  %v833_v44 = vmul.f32 %v3235_v7, %v3561_v46  ;;  %v836_v8 = vmul.f32 %v3235_v7, %v3572_v63  ;;  %v835_v53 = vmul.f32 %v3235_v7, %v3567_v57  ;;  %v3085_v7 = vld [vmem:[#allocation7 + $0x2e8] ss:$16 sps:$4 sm:$0xff]  }
 0x2f4   :  { %v889_v10 = vadd.f32 %v878_v4, %v860_v1  ;;  %v888_v12 = vadd.f32 %v874_v47, %v859_v60  ;;  %v887_v14 = vadd.f32 %v870_v6, %v858_v5  ;;  %v890_v19 = vadd.f32 %v882_v51, %v861_v9  ;;  %v3079_v60 = vld [vmem:[#allocation7 + $0x2c8] ss:$16 sps:$4 sm:$0xff]   ;;  %v3084_v5 = vld [vmem:[#allocation7 + $0x2e4] ss:$16 sps:$4 sm:$0xff]   ;;  %v3082_v1 = vld [vmem:[#allocation7 + $0x2e0] ss:$16 sps:$4 sm:$0xff]  }
 0x2f5   :  { %v863_v11 = vmul.f32 %v845_v56, %v834_v45  ;;  %v862_v13 = vmul.f32 %v841_v58, %v833_v44  ;;  %v865_v15 = vmul.f32 %v853_v48, %v836_v8  ;;  %v864_v16 = vmul.f32 %v849_v43, %v835_v53  ;;  %v3066_v56 = vld [vmem:[#allocation7 + $0x284] ss:$16 sps:$4 sm:$0xff]   ;;  %v3069_v58 = vld [vmem:[#allocation7 + $0x28c] ss:$16 sps:$4 sm:$0xff]   ;;  %v3064_v43 = vld [vmem:[#allocation7 + $0x280] ss:$16 sps:$4 sm:$0xff]  }
 0x2f6   :  { %v896_v46 = vmax.f32 %v888_v12, 0.0  ;;  %v895_v22 = vmax.f32 %v887_v14, 0.0  ;;  %v897_v24 = vmax.f32 %v889_v10, 0.0  ;;  %v898_v29 = vmax.f32 %v890_v19, 0.0  ;;  %v3081_v48 = vld [vmem:[#allocation7 + $0x2cc] ss:$16 sps:$4 sm:$0xff]  }
 0x2f7   :  { %v892_v17 = vadd.f32 %v874_v47, %v863_v11  ;;  %v891_v18 = vadd.f32 %v870_v6, %v862_v13  ;;  %v894_v55 = vadd.f32 %v882_v51, %v865_v15  ;;  %v893_v20 = vadd.f32 %v878_v4, %v864_v16  ;;  %v3073_v47 = vld [vmem:[#allocation7 + $0x2a8] ss:$16 sps:$4 sm:$0xff]   ;;  %v3076_v4 = vld [vmem:[#allocation7 + $0x2c0] ss:$16 sps:$4 sm:$0xff]   ;;  %v3087_v6 = vld [vmem:[#allocation7 + $0x2ec] ss:$16 sps:$4 sm:$0xff]  }
 0x2f8   :  { %v3090_v45 = vld [vmem:[#allocation7 + $0x304] ss:$16 sps:$4 sm:$0xff]   ;;  %v3093_v44 = vld [vmem:[#allocation7 + $0x30c] ss:$16 sps:$4 sm:$0xff]   ;;  %v3088_v51 = vld [vmem:[#allocation7 + $0x300] ss:$16 sps:$4 sm:$0xff]  }
 0x2f9   :  { %v900_v21 = vmax.f32 %v892_v17, 0.0  ;;  %v899_v23 = vmax.f32 %v891_v18, 0.0  ;;  %v902_v63 = vmax.f32 %v894_v55, 0.0  ;;  %v901_v25 = vmax.f32 %v893_v20, 0.0  ;;  %v3091_v8 = vld [vmem:[#allocation7 + $0x308] ss:$16 sps:$4 sm:$0xff]  }
 0x2fa   :  { %v3096_v9 = vld [vmem:[#allocation7 + $0x324] ss:$16 sps:$4 sm:$0xff]   ;;  %v3099_v53 = vld [vmem:[#allocation7 + $0x32c] ss:$16 sps:$4 sm:$0xff]   ;;  %v3094_v10 = vld [vmem:[#allocation7 + $0x320] ss:$16 sps:$4 sm:$0xff]  }
 0x2fb   :  { %v904_v57 = vpack.c.bf16 %v900_v21, %v896_v46  ;;  %v903_v28 = vpack.c.bf16 %v899_v23, %v895_v22  ;;  %v3604_v30 = vpack.c.bf16 %v901_v25, %v897_v24  ;;  %v906_v34 = vpack.c.bf16 %v902_v63, %v898_v29  ;;  %v3097_v11 = vld [vmem:[#allocation7 + $0x328] ss:$16 sps:$4 sm:$0xff]   ;;  %v3102_v12 = vld [vmem:[#allocation7 + $0x344] ss:$16 sps:$4 sm:$0xff]   ;;  %v3105_v13 = vld [vmem:[#allocation7 + $0x34c] ss:$16 sps:$4 sm:$0xff]  }
 0x2fc   :  { %v3100_v14 = vld [vmem:[#allocation7 + $0x340] ss:$16 sps:$4 sm:$0xff]   ;;  %v3103_v15 = vld [vmem:[#allocation7 + $0x348] ss:$16 sps:$4 sm:$0xff]   ;;  %v3108_v16 = vld [vmem:[#allocation7 + $0x364] ss:$16 sps:$4 sm:$0xff]  }
 0x2fd   :  { %1729 = vmatprep.mubr.bf16.mxu0 %v904_v57  ;;  %1815 = vmatprep.mubr.bf16.mxu1 %v904_v57  ;;  %v3111_v17 = vld [vmem:[#allocation7 + $0x36c] ss:$16 sps:$4 sm:$0xff]   ;;  %v3106_v18 = vld [vmem:[#allocation7 + $0x360] ss:$16 sps:$4 sm:$0xff]   ;;  %v3109_v19 = vld [vmem:[#allocation7 + $0x368] ss:$16 sps:$4 sm:$0xff]  }
 0x2fe   :  { %1730 = vmatmul.mubr.bf16.vlgmr.msra.gmra.mrb[4].mxu0 %v903_v28  ;;  %1816 = vmatmul.mubr.bf16.vlgmr.msra.gmra.mrb[8].mxu1 %v903_v28  ;;  %v3114_v55 = vld [vmem:[#allocation7 + $0x384] ss:$16 sps:$4 sm:$0xff]   ;;  %v3117_v20 = vld [vmem:[#allocation7 + $0x38c] ss:$16 sps:$4 sm:$0xff]   ;;  %v3112_v46 = vld [vmem:[#allocation7 + $0x380] ss:$16 sps:$4 sm:$0xff]  }
 0x2ff   :  { %1741 = vmatpush1.bf16.msra.mxu0 %v3040_v26  ;;  %1827 = vmatpush1.bf16.msra.mxu1 %v3043_v27  ;;  %v3115_v21 = vld [vmem:[#allocation7 + $0x388] ss:$16 sps:$4 sm:$0xff]   ;;  %v3120_v22 = vld [vmem:[#allocation7 + $0x3a4] ss:$16 sps:$4 sm:$0xff]   ;;  %v3123_v23 = vld [vmem:[#allocation7 + $0x3ac] ss:$16 sps:$4 sm:$0xff]  }
 0x300   :  { %1772 = vmatprep.mubr.bf16.mxu0 %v906_v34  ;;  %1858 = vmatprep.mubr.bf16.mxu1 %v906_v34  ;;  %v3118_v63 = vld [vmem:[#allocation7 + $0x3a0] ss:$16 sps:$4 sm:$0xff]   ;;  %v3121_v24 = vld [vmem:[#allocation7 + $0x3a8] ss:$16 sps:$4 sm:$0xff]   ;;  %v3126_v25 = vld [vmem:[#allocation7 + $0x3c4] ss:$16 sps:$4 sm:$0xff]  }
 0x301   :  { %1742 = vmatprep.subr.bf16.mxu0 %v3048_v31  ;;  %1828 = vmatprep.subr.bf16.mxu1 %v3051_v32  ;;  %v3129_v57 = vld [vmem:[#allocation7 + $0x3cc] ss:$16 sps:$4 sm:$0xff]   ;;  %v3124_v26 = vld [vmem:[#allocation7 + $0x3c0] ss:$16 sps:$4 sm:$0xff]   ;;  %v3127_v27 = vld [vmem:[#allocation7 + $0x3c8] ss:$16 sps:$4 sm:$0xff]  }
 0x302   :  { %v3132_v28 = vld [vmem:[#allocation7 + $0x3e4] ss:$16 sps:$4 sm:$0xff]   ;;  %v3135_v29 = vld [vmem:[#allocation7 + $0x3ec] ss:$16 sps:$4 sm:$0xff]   ;;  %v3130_v31 = vld [vmem:[#allocation7 + $0x3e0] ss:$16 sps:$4 sm:$0xff]  }
 0x303   :  { %1743 = vmatpush1.bf16.msra.mxu0 %v3046_v36  ;;  %1829 = vmatpush1.bf16.msra.mxu1 %v3049_v37  ;;  %v3133_v32 = vld [vmem:[#allocation7 + $0x3e8] ss:$16 sps:$4 sm:$0xff]   ;;  %v1035_v34 = vld [vmem:[%s3710_s6] sm:$0xf] }
 0x304   :  { %1744 = vmatprep.subr.bf16.mxu0 %v3054_v38  ;;  %1830 = vmatprep.subr.bf16.mxu1 %v3057_v33  ;;  %v1040_v36 = vrot.slane %v1035_v34, %v3503_v0  ;;  %v1044_v37 = vrot.slane %v1035_v34, %v3508_v35  ;;  %v1048_v33 = vrot.slane %v1035_v34, %v3520_v49 }
 0x307   :  { %1745 = vmatpush1.bf16.msra.mxu0 %v3052_v39  ;;  %1831 = vmatpush1.bf16.msra.mxu1 %v3055_v40 }
 0x308   :  { %1746 = vmatprep.subr.bf16.mxu0 %v3060_v41  ;;  %1832 = vmatprep.subr.bf16.mxu1 %v3063_v42 }
 0x30b   :  { %1747 = vmatpush1.bf16.msra.mxu0 %v3058_v52  ;;  %1833 = vmatpush1.bf16.msra.mxu1 %v3061_v54 }
 0x30c   :  { %1748 = vmatprep.subr.bf16.mxu0 %v3066_v56  ;;  %1834 = vmatprep.subr.bf16.mxu1 %v3069_v58 }
 0x30f   :  { %1749 = vmatpush1.bf16.msra.mxu0 %v3064_v43  ;;  %1835 = vmatpush1.bf16.msra.mxu1 %v3067_v59 }
 0x310   :  { %1750 = vmatprep.subr.bf16.mxu0 %v3072_v61  ;;  %1836 = vmatprep.subr.bf16.mxu1 %v3075_v62 }
 0x313   :  { %1751 = vmatpush1.bf16.msra.mxu0 %v3070_v2  ;;  %1837 = vmatpush1.bf16.msra.mxu1 %v3073_v47 }
 0x314   :  { %1752 = vmatprep.subr.bf16.mxu0 %v3078_v3  ;;  %1838 = vmatprep.subr.bf16.mxu1 %v3081_v48 }
 0x317   :  { %1753 = vmatpush1.bf16.msra.mxu0 %v3076_v4  ;;  %1839 = vmatpush1.bf16.msra.mxu1 %v3079_v60 }
 0x318   :  { %1754 = vmatprep.subr.bf16.mxu0 %v3084_v5  ;;  %1840 = vmatprep.subr.bf16.mxu1 %v3087_v6 }
 0x31b   :  { %1755 = vmatpush1.bf16.msra.mxu0 %v3082_v1  ;;  %1841 = vmatpush1.bf16.msra.mxu1 %v3085_v7  ;;  %v3136_v7 = vld [vmem:[#allocation8] ss:$8 sps:$4 sm:$0xff]  }
 0x31c   :  { %1756 = vmatprep.subr.bf16.mxu0 %v3090_v45  ;;  %1842 = vmatprep.subr.bf16.mxu1 %v3093_v44  ;;  %v3138_v45 = vld [vmem:[#allocation8 + $0x4] ss:$8 sps:$4 sm:$0xff]   ;;  %v3141_v44 = vld [vmem:[#allocation8 + $0x14] ss:$8 sps:$4 sm:$0xff]  }
 0x31f   :  { %1757 = vmatpush1.bf16.msra.mxu0 %v3088_v51  ;;  %1843 = vmatpush1.bf16.msra.mxu1 %v3091_v8  ;;  %v3139_v51 = vld [vmem:[#allocation8 + $0x10] ss:$8 sps:$4 sm:$0xff]   ;;  %v3144_v8 = vld [vmem:[#allocation8 + $0x24] ss:$8 sps:$4 sm:$0xff]  }
 0x320   :  { %1758 = vmatprep.subr.bf16.mxu0 %v3096_v9  ;;  %1844 = vmatprep.subr.bf16.mxu1 %v3099_v53  ;;  %v3142_v9 = vld [vmem:[#allocation8 + $0x20] ss:$8 sps:$4 sm:$0xff]   ;;  %v3147_v53 = vld [vmem:[#allocation8 + $0x34] ss:$8 sps:$4 sm:$0xff]  }
 0x323   :  { %1759 = vmatpush1.bf16.msra.mxu0 %v3094_v10  ;;  %1845 = vmatpush1.bf16.msra.mxu1 %v3097_v11  ;;  %v3145_v10 = vld [vmem:[#allocation8 + $0x30] ss:$8 sps:$4 sm:$0xff]   ;;  %v3150_v11 = vld [vmem:[#allocation8 + $0x44] ss:$8 sps:$4 sm:$0xff]  }
 0x324   :  { %1760 = vmatprep.subr.bf16.mxu0 %v3102_v12  ;;  %1846 = vmatprep.subr.bf16.mxu1 %v3105_v13  ;;  %v3148_v12 = vld [vmem:[#allocation8 + $0x40] ss:$8 sps:$4 sm:$0xff]   ;;  %v3153_v13 = vld [vmem:[#allocation8 + $0x54] ss:$8 sps:$4 sm:$0xff]  }
 0x327   :  { %1761 = vmatpush1.bf16.msra.mxu0 %v3100_v14  ;;  %1847 = vmatpush1.bf16.msra.mxu1 %v3103_v15  ;;  %v3151_v14 = vld [vmem:[#allocation8 + $0x50] ss:$8 sps:$4 sm:$0xff]   ;;  %v3156_v15 = vld [vmem:[#allocation8 + $0x64] ss:$8 sps:$4 sm:$0xff]  }
 0x328   :  { %1762 = vmatprep.subr.bf16.mxu0 %v3108_v16  ;;  %1848 = vmatprep.subr.bf16.mxu1 %v3111_v17  ;;  %v3154_v16 = vld [vmem:[#allocation8 + $0x60] ss:$8 sps:$4 sm:$0xff]   ;;  %v3159_v17 = vld [vmem:[#allocation8 + $0x74] ss:$8 sps:$4 sm:$0xff]  }
 0x32b   :  { %1763 = vmatpush1.bf16.msra.mxu0 %v3106_v18  ;;  %1849 = vmatpush1.bf16.msra.mxu1 %v3109_v19  ;;  %v3157_v18 = vld [vmem:[#allocation8 + $0x70] ss:$8 sps:$4 sm:$0xff]   ;;  %v3162_v19 = vld [vmem:[#allocation8 + $0x84] ss:$8 sps:$4 sm:$0xff]  }
 0x32c   :  { %1764 = vmatprep.subr.bf16.mxu0 %v3114_v55  ;;  %1850 = vmatprep.subr.bf16.mxu1 %v3117_v20  ;;  %v3160_v55 = vld [vmem:[#allocation8 + $0x80] ss:$8 sps:$4 sm:$0xff]   ;;  %v3165_v20 = vld [vmem:[#allocation8 + $0x94] ss:$8 sps:$4 sm:$0xff]  }
 0x32f   :  { %1765 = vmatpush1.bf16.msra.mxu0 %v3112_v46  ;;  %1851 = vmatpush1.bf16.msra.mxu1 %v3115_v21  ;;  %v3163_v46 = vld [vmem:[#allocation8 + $0x90] ss:$8 sps:$4 sm:$0xff]  }
 0x330   :  { %1766 = vmatprep.subr.bf16.mxu0 %v3120_v22  ;;  %1852 = vmatprep.subr.bf16.mxu1 %v3123_v23 }
 0x333   :  { %1767 = vmatpush1.bf16.msra.mxu0 %v3118_v63  ;;  %1853 = vmatpush1.bf16.msra.mxu1 %v3121_v24 }
 0x334   :  { %1768 = vmatprep.subr.bf16.mxu0 %v3126_v25  ;;  %1854 = vmatprep.subr.bf16.mxu1 %v3129_v57 }
 0x337   :  { %1769 = vmatpush1.bf16.msra.mxu0 %v3124_v26  ;;  %1855 = vmatpush1.bf16.msra.mxu1 %v3127_v27 }
 0x338   :  { %1770 = vmatprep.subr.bf16.mxu0 %v3132_v28  ;;  %1856 = vmatprep.subr.bf16.mxu1 %v3135_v29 }
 0x33b   :  { %1771 = vmatpush1.bf16.msra.mxu0 %v3130_v31  ;;  %1857 = vmatpush1.bf16.msra.mxu1 %v3133_v32 }
 0x33c   :  { %2389 = vmatprep.subr.bf16.mxu0 %v3138_v45 }
 0x33e   :  { %1773 = vmatmul.mubr.bf16.vlgmr.msra.gmra.mrb[4].mxu0 %v3604_v30  ;;  %1859 = vmatmul.mubr.bf16.vlgmr.msra.gmra.mrb[8].mxu1 %v3604_v30  ;;  %v1052_v30 = vrot.slane %v1035_v34, %v3522_v50 }
 0x33f   :  { %2390 = vmatpush1.bf16.msra.mxu0 %v3136_v7 }
 0x340   :  { %2391 = vmatprep.subr.bf16.mxu0 %v3141_v44 }
 0x343   :  { %2392 = vmatpush1.bf16.msra.mxu0 %v3139_v51 }
 0x344   :  { %2393 = vmatprep.subr.bf16.mxu0 %v3144_v8 }
 0x347   :  { %2394 = vmatpush1.bf16.msra.mxu0 %v3142_v9  ;;  %v1869_v9 = vld [vmem:[%s3711_s7] sm:$0xf] }
 0x348   :  { %2395 = vmatprep.subr.bf16.mxu0 %v3147_v53  ;;  %v1870_v53 = vld [vmem:[%s3712_s8] sm:$0xf] }
 0x34b   :  { %2396 = vmatpush1.bf16.msra.mxu0 %v3145_v10  ;;  %v1931_v10 = vrot.slane %v1869_v9, %v3508_v35 }
 0x34c   :  { %2397 = vmatprep.subr.bf16.mxu0 %v3150_v11  ;;  %v1927_v11 = vrot.slane %v1869_v9, %v3503_v0 }
 0x34f   :  { %2398 = vmatpush1.bf16.msra.mxu0 %v3148_v12 }
 0x350   :  { %2399 = vmatprep.subr.bf16.mxu0 %v3153_v13  ;;  %v1960_v13 = vrot.slane %v1870_v53, %v3508_v35 }
 0x353   :  { %2400 = vmatpush1.bf16.msra.mxu0 %v3151_v14  ;;  %v1956_v14 = vrot.slane %v1870_v53, %v3503_v0 }
 0x354   :  { %2401 = vmatprep.subr.bf16.mxu0 %v3156_v15  ;;  %v1939_v15 = vrot.slane %v1869_v9, %v3522_v50 }
 0x357   :  { %2402 = vmatpush1.bf16.msra.mxu0 %v3154_v16  ;;  %v1935_v16 = vrot.slane %v1869_v9, %v3520_v49  ;;  %v3205_v9 = vld [vmem:[#allocation8 + $0x170] ss:$8 sps:$4 sm:$0xff]  }
 0x358   :  { %2403 = vmatprep.subr.bf16.mxu0 %v3159_v17 }
 0x35b   :  { %2404 = vmatpush1.bf16.msra.mxu0 %v3157_v18 }
 0x35c   :  { %2405 = vmatprep.subr.bf16.mxu0 %v3162_v19 }
 0x35f   :  { %2406 = vmatpush1.bf16.msra.mxu0 %v3160_v55 }
 0x360   :  { %2407 = vmatprep.subr.bf16.mxu0 %v3165_v20 }
 0x363   :  { %2408 = vmatpush1.bf16.msra.mxu0 %v3163_v46  ;;  %v1968_v46 = vrot.slane %v1870_v53, %v3522_v50 }
 0x411   :  { %v1774_v38 = vpop.f32.mrb[4].mxu0  ;;  %v1860_v39 = vpop.f32.mrb[8].mxu1 }
 0x412   :  { %v3614_v40 = vadd.f32 %v1774_v38, %v1040_v36  ;;  %v1776_v41 = vpop.f32.mrb[5].mxu0  ;;  %v1862_v42 = vpop.f32.mrb[9].mxu1  ;;  %v2788_v61 = vadd.f32 %v1860_v39, %v1048_v33 }
 0x413   :  { %v3616_v52 = vadd.f32 %v1776_v41, %v1044_v37  ;;  %v1778_v54 = vpop.f32.mrb[6].mxu0  ;;  %v1864_v56 = vpop.f32.mrb[10].mxu1  ;;  %v2789_v47 = vadd.f32 %v1862_v42, %v1052_v30 }
 0x414   :  { %v3619_v58 = vadd.f32 %v1778_v54, %v1040_v36  ;;  %v1780_v43 = vpop.f32.mrb[7].mxu0  ;;  %v1866_v59 = vpop.f32.mrb[11].mxu1  ;;  %v2790_v3 = vadd.f32 %v1864_v56, %v1048_v33 }
 0x415   :  { %v1871_v62 = vadd.f32 %v3616_v52, %v3614_v40  ;;  %v2787_v2 = vadd.f32 %v1780_v43, %v1044_v37  ;;  %v2791_v60 = vadd.f32 %v1866_v59, %v1052_v30  ;;  %v3166_v43 = vld [vmem:[#allocation8 + $0xa0] ss:$8 sps:$4 sm:$0xff]   ;;  %v3169_v59 = vld [vmem:[#allocation8 + $0xb0] ss:$8 sps:$4 sm:$0xff]  }
 0x417   :  { %v1876_v48 = vadd.f32 %v2787_v2, %v3619_v58  ;;  %v1872_v4 = vadd.f32 %v2788_v61, %v1871_v62  ;;  %v3174_v62 = vld [vmem:[#allocation8 + $0xc4] ss:$8 sps:$4 sm:$0xff]  }
 0x419   :  { %v1873_v5 = vadd.f32 %v2789_v47, %v1872_v4  ;;  %v1877_v6 = vadd.f32 %v2790_v3, %v1876_v48  ;;  %v3180_v48 = vld [vmem:[#allocation8 + $0xe4] ss:$8 sps:$4 sm:$0xff]   ;;  %v3178_v4 = vld [vmem:[#allocation8 + $0xe0] ss:$8 sps:$4 sm:$0xff]  }
 0x41b   :  { %1874 = vadd.xlane.f32.xlu0 %v1873_v5  ;;  %v1878_v1 = vadd.f32 %v2791_v60, %v1877_v6  ;;  %v3181_v5 = vld [vmem:[#allocation8 + $0xf0] ss:$8 sps:$4 sm:$0xff]   ;;  %v3186_v6 = vld [vmem:[#allocation8 + $0x104] ss:$8 sps:$4 sm:$0xff]  }
 0x41d   :  { %1879 = vadd.xlane.f32.xlu1 %v1878_v1 }
 0x4a8   :  { %v1875_v21 = vpop.xlane.xlu0 %1874 }
 0x4a9   :  { %v1881_v22 = vmul.f32 0.001953125, %v1875_v21  ;;  %v1964_v21 = vrot.slane %v1870_v53, %v3520_v49  ;;  %v3210_v53 = vld [vmem:[#allocation8 + $0x184] ss:$8 sps:$4 sm:$0xff]  }
 0x4aa   :  { %v1880_v23 = vpop.xlane.xlu1 %1879 }
 0x4ab   :  { %v3625_v63 = vsub.f32 %v3614_v40, %v1881_v22  ;;  %v3628_v24 = vsub.f32 %v3616_v52, %v1881_v22  ;;  %v1882_v25 = vmul.f32 0.001953125, %v1880_v23  ;;  %v3630_v57 = vsub.f32 %v2788_v61, %v1881_v22  ;;  %v3171_v61 = vld [vmem:[#allocation8 + $0xb4] ss:$8 sps:$4 sm:$0xff]  }
 0x4ac   :  { %v3632_v26 = vsub.f32 %v2789_v47, %v1881_v22  ;;  %v3177_v47 = vld [vmem:[#allocation8 + $0xd4] ss:$8 sps:$4 sm:$0xff]  }
 0x4ad   :  { %v3635_v27 = vsub.f32 %v3619_v58, %v1882_v25  ;;  %v3637_v28 = vsub.f32 %v2787_v2, %v1882_v25  ;;  %v1891_v29 = vmul.f32 %v3625_v63, %v3625_v63  ;;  %v1892_v31 = vmul.f32 %v3628_v24, %v3628_v24  ;;  %v3168_v58 = vld [vmem:[#allocation8 + $0xa4] ss:$8 sps:$4 sm:$0xff]   ;;  %v3172_v2 = vld [vmem:[#allocation8 + $0xc0] ss:$8 sps:$4 sm:$0xff]  }
 0x4ae   :  { %v1893_v32 = vmul.f32 %v3630_v57, %v3630_v57  ;;  %v3645_v34 = vsub.f32 %v2790_v3, %v1882_v25  ;;  %v3647_v37 = vsub.f32 %v2791_v60, %v1882_v25  ;;  %v1894_v39 = vmul.f32 %v3632_v26, %v3632_v26  ;;  %2409 = vmatprep.subr.bf16.mxu0 %v3168_v58  ;;  %v3175_v3 = vld [vmem:[#allocation8 + $0xd0] ss:$8 sps:$4 sm:$0xff]   ;;  %v3183_v60 = vld [vmem:[#allocation8 + $0xf4] ss:$8 sps:$4 sm:$0xff]  }
 0x4af   :  { %v1899_v36 = vadd.f32 %v1892_v31, %v1891_v29  ;;  %v1895_v38 = vmul.f32 %v3635_v27, %v3635_v27  ;;  %v1896_v33 = vmul.f32 %v3637_v28, %v3637_v28  ;;  %2410 = vmatpush1.bf16.msra.mxu0 %v3166_v43  ;;  %v3184_v43 = vld [vmem:[#allocation8 + $0x100] ss:$8 sps:$4 sm:$0xff]  }
 0x4b0   :  { %v1897_v41 = vmul.f32 %v3645_v34, %v3645_v34  ;;  %v1898_v30 = vmul.f32 %v3647_v37, %v3647_v37  ;;  %2411 = vmatprep.subr.bf16.mxu0 %v3171_v61 }
 0x4b1   :  { %v1900_v40 = vadd.f32 %v1899_v36, %v1893_v32  ;;  %v1904_v42 = vadd.f32 %v1896_v33, %v1895_v38 }
 0x4b3   :  { %v1901_v52 = vadd.f32 %v1900_v40, %v1894_v39  ;;  %v1905_v54 = vadd.f32 %v1904_v42, %v1897_v41  ;;  %2412 = vmatpush1.bf16.msra.mxu0 %v3169_v59 }
 0x4b4   :  { %2413 = vmatprep.subr.bf16.mxu0 %v3174_v62  ;;  %v3189_v62 = vld [vmem:[#allocation8 + $0x114] ss:$8 sps:$4 sm:$0xff]  }
 0x4b5   :  { %1902 = vadd.xlane.f32.xlu0 %v1901_v52  ;;  %v1906_v56 = vadd.f32 %v1905_v54, %v1898_v30 }
 0x4b7   :  { %1907 = vadd.xlane.f32.xlu1 %v1906_v56  ;;  %2414 = vmatpush1.bf16.msra.mxu0 %v3172_v2 }
 0x4b8   :  { %2415 = vmatprep.subr.bf16.mxu0 %v3177_v47 }
 0x4bb   :  { %2416 = vmatpush1.bf16.msra.mxu0 %v3175_v3  ;;  %v3187_v3 = vld [vmem:[#allocation8 + $0x110] ss:$8 sps:$4 sm:$0xff]  }
 0x4bc   :  { %2417 = vmatprep.subr.bf16.mxu0 %v3180_v48  ;;  %v3192_v48 = vld [vmem:[#allocation8 + $0x124] ss:$8 sps:$4 sm:$0xff]  }
 0x4bf   :  { %2418 = vmatpush1.bf16.msra.mxu0 %v3178_v4  ;;  %v3190_v4 = vld [vmem:[#allocation8 + $0x120] ss:$8 sps:$4 sm:$0xff]  }
 0x4c0   :  { %2419 = vmatprep.subr.bf16.mxu0 %v3183_v60  ;;  %v3195_v60 = vld [vmem:[#allocation8 + $0x134] ss:$8 sps:$4 sm:$0xff]  }
 0x4c3   :  { %2420 = vmatpush1.bf16.msra.mxu0 %v3181_v5  ;;  %v3193_v5 = vld [vmem:[#allocation8 + $0x130] ss:$8 sps:$4 sm:$0xff]  }
 0x4c4   :  { %2432 = vmatprep.subr.bf16.mxu0 %v3186_v6  ;;  %v3198_v6 = vld [vmem:[#allocation8 + $0x144] ss:$8 sps:$4 sm:$0xff]  }
 0x542   :  { %v1903_v1 = vpop.xlane.xlu0 %1902 }
 0x543   :  { %v1909_v7 = vmul.f32 0.001953125, %v1903_v1  ;;  %v3196_v1 = vld [vmem:[#allocation8 + $0x140] ss:$8 sps:$4 sm:$0xff]  }
 0x544   :  { %v1908_v45 = vpop.xlane.xlu1 %1907 }
 0x545   :  { %v1911_v44 = vadd.f32 1e-05, %v1909_v7  ;;  %v1910_v51 = vmul.f32 0.001953125, %v1908_v45  ;;  %v3201_v7 = vld [vmem:[#allocation8 + $0x154] ss:$8 sps:$4 sm:$0xff]  }
 0x546   :  { %v3199_v45 = vld [vmem:[#allocation8 + $0x150] ss:$8 sps:$4 sm:$0xff]  }
 0x547   :  { %3236 = vrsqrt.f32 %v1911_v44  ;;  %v1912_v8 = vadd.f32 1e-05, %v1910_v51  ;;  %v3204_v44 = vld [vmem:[#allocation8 + $0x164] ss:$8 sps:$4 sm:$0xff]   ;;  %v3202_v51 = vld [vmem:[#allocation8 + $0x160] ss:$8 sps:$4 sm:$0xff]  }
 0x549   :  { %3238 = vrsqrt.f32 %v1912_v8  ;;  %v3207_v8 = vld [vmem:[#allocation8 + $0x174] ss:$8 sps:$4 sm:$0xff]  }
 0x551   :  { %v3237_v12 = vpop.eup %3236 }
 0x552   :  { %v1916_v17 = vmul.f32 %v3237_v12, %v3628_v24  ;;  %v1915_v18 = vmul.f32 %v3237_v12, %v3625_v63  ;;  %v1918_v19 = vmul.f32 %v3237_v12, %v3632_v26  ;;  %v1917_v55 = vmul.f32 %v3237_v12, %v3630_v57  ;;  %v3211_v12 = vld [vmem:[#allocation8 + $0x190] ss:$8 sps:$4 sm:$0xff]  }
 0x553   :  { %v3239_v20 = vpop.eup %3238 }
 0x554   :  { %v1920_v22 = vmul.f32 %v3239_v20, %v3637_v28  ;;  %v1945_v23 = vmul.f32 %v1931_v10, %v1916_v17  ;;  %v1919_v25 = vmul.f32 %v3239_v20, %v3635_v27  ;;  %v1944_v29 = vmul.f32 %v1927_v11, %v1915_v18  ;;  %v3222_v17 = vld [vmem:[#allocation8 + $0x1c4] ss:$8 sps:$4 sm:$0xff]   ;;  %v3220_v18 = vld [vmem:[#allocation8 + $0x1c0] ss:$8 sps:$4 sm:$0xff]  }
 0x555   :  { %v1922_v31 = vmul.f32 %v3239_v20, %v3647_v37  ;;  %v1947_v24 = vmul.f32 %v1939_v15, %v1918_v19  ;;  %v1921_v63 = vmul.f32 %v3239_v20, %v3645_v34  ;;  %v1946_v32 = vmul.f32 %v1935_v16, %v1917_v55  ;;  %v3225_v19 = vld [vmem:[#allocation8 + $0x1d4] ss:$8 sps:$4 sm:$0xff]   ;;  %v3223_v55 = vld [vmem:[#allocation8 + $0x1d0] ss:$8 sps:$4 sm:$0xff]   ;;  %v3228_v20 = vld [vmem:[#allocation8 + $0x1e4] ss:$8 sps:$4 sm:$0xff]  }
 0x556   :  { %v1949_v26 = vmul.f32 %v1931_v10, %v1920_v22  ;;  %v1974_v36 = vadd.f32 %v1960_v13, %v1945_v23  ;;  %v1948_v57 = vmul.f32 %v1927_v11, %v1919_v25  ;;  %v1973_v38 = vadd.f32 %v1956_v14, %v1944_v29  ;;  %v3208_v10 = vld [vmem:[#allocation8 + $0x180] ss:$8 sps:$4 sm:$0xff]   ;;  %v3213_v11 = vld [vmem:[#allocation8 + $0x194] ss:$8 sps:$4 sm:$0xff]   ;;  %v3229_v22 = vld [vmem:[#allocation8 + $0x1f0] ss:$8 sps:$4 sm:$0xff]  }
 0x557   :  { %v1951_v33 = vmul.f32 %v1939_v15, %v1922_v31  ;;  %v1950_v50 = vmul.f32 %v1935_v16, %v1921_v63  ;;  %v1975_v39 = vadd.f32 %v1964_v21, %v1946_v32  ;;  %v1976_v28 = vadd.f32 %v1968_v46, %v1947_v24  ;;  %v3219_v15 = vld [vmem:[#allocation8 + $0x1b4] ss:$8 sps:$4 sm:$0xff]   ;;  %v3217_v16 = vld [vmem:[#allocation8 + $0x1b0] ss:$8 sps:$4 sm:$0xff]  }
 0x558   :  { %v1978_v49 = vadd.f32 %v1960_v13, %v1949_v26  ;;  %v1977_v40 = vadd.f32 %v1956_v14, %v1948_v57  ;;  %v1982_v27 = vmax.f32 %v1974_v36, 0.0  ;;  %v1981_v30 = vmax.f32 %v1973_v38, 0.0  ;;  %v3216_v13 = vld [vmem:[#allocation8 + $0x1a4] ss:$8 sps:$4 sm:$0xff]   ;;  %v3214_v14 = vld [vmem:[#allocation8 + $0x1a0] ss:$8 sps:$4 sm:$0xff]  }
 0x559   :  { %v1980_v41 = vadd.f32 %v1968_v46, %v1951_v33  ;;  %v1979_v42 = vadd.f32 %v1964_v21, %v1950_v50  ;;  %v1983_v56 = vmax.f32 %v1975_v39, 0.0  ;;  %v1984_v61 = vmax.f32 %v1976_v28, 0.0  ;;  %v3226_v46 = vld [vmem:[#allocation8 + $0x1e0] ss:$8 sps:$4 sm:$0xff]   ;;  %v3231_v21 = vld [vmem:[#allocation8 + $0x1f4] ss:$8 sps:$4 sm:$0xff]  }
 0x55a   :  { %v1986_v52 = vmax.f32 %v1978_v49, 0.0  ;;  %v1985_v37 = vmax.f32 %v1977_v40, 0.0  ;;  %v2057_v23 = vld [vmem:[%s3714_s10] sm:$0x3] }
 0x55b   :  { %v1988_v54 = vmax.f32 %v1980_v41, 0.0  ;;  %v1987_v34 = vmax.f32 %v1979_v42, 0.0  ;;  %v2062_v25 = vrot.slane %v2057_v23, %v3503_v0  ;;  %v2066_v29 = vrot.slane %v2057_v23, %v3508_v35 }
 0x55c   :  { %v1990_v58 = vpack.c.bf16 %v1986_v52, %v1982_v27  ;;  %v1989_v59 = vpack.c.bf16 %v1985_v37, %v1981_v30 }
 0x55d   :  { %v3681_v2 = vpack.c.bf16 %v1987_v34, %v1983_v56  ;;  %v1992_v47 = vpack.c.bf16 %v1988_v54, %v1984_v61 }
 0x55e   :  { %2421 = vmatprep.mubr.bf16.mxu0 %v1990_v58 }
 0x55f   :  { %2422 = vmatmul.mubr.bf16.vlgmr.msra.gmra.mrb[8].mxu0 %v1989_v59 }
 0x560   :  { %2433 = vmatpush1.bf16.msra.mxu0 %v3184_v43  ;;  %2464 = vmatprep.mubr.bf16.mxu0 %v1992_v47 }
 0x561   :  { %2434 = vmatprep.subr.bf16.mxu0 %v3189_v62 }
 0x564   :  { %2435 = vmatpush1.bf16.msra.mxu0 %v3187_v3 }
 0x565   :  { %2436 = vmatprep.subr.bf16.mxu0 %v3192_v48 }
 0x568   :  { %2437 = vmatpush1.bf16.msra.mxu0 %v3190_v4 }
 0x569   :  { %2438 = vmatprep.subr.bf16.mxu0 %v3195_v60 }
 0x56c   :  { %2439 = vmatpush1.bf16.msra.mxu0 %v3193_v5 }
 0x56d   :  { %2440 = vmatprep.subr.bf16.mxu0 %v3198_v6 }
 0x570   :  { %2441 = vmatpush1.bf16.msra.mxu0 %v3196_v1 }
 0x571   :  { %2442 = vmatprep.subr.bf16.mxu0 %v3201_v7 }
 0x574   :  { %2443 = vmatpush1.bf16.msra.mxu0 %v3199_v45 }
 0x575   :  { %2444 = vmatprep.subr.bf16.mxu0 %v3204_v44 }
 0x578   :  { %2445 = vmatpush1.bf16.msra.mxu0 %v3202_v51 }
 0x579   :  { %2446 = vmatprep.subr.bf16.mxu0 %v3207_v8 }
 0x57c   :  { %2447 = vmatpush1.bf16.msra.mxu0 %v3205_v9 }
 0x57d   :  { %2448 = vmatprep.subr.bf16.mxu0 %v3210_v53 }
 0x580   :  { %2449 = vmatpush1.bf16.msra.mxu0 %v3208_v10 }
 0x581   :  { %2450 = vmatprep.subr.bf16.mxu0 %v3213_v11 }
 0x584   :  { %2451 = vmatpush1.bf16.msra.mxu0 %v3211_v12 }
 0x585   :  { %2452 = vmatprep.subr.bf16.mxu0 %v3216_v13 }
 0x588   :  { %2453 = vmatpush1.bf16.msra.mxu0 %v3214_v14 }
 0x589   :  { %2454 = vmatprep.subr.bf16.mxu0 %v3219_v15 }
 0x58c   :  { %2455 = vmatpush1.bf16.msra.mxu0 %v3217_v16 }
 0x58d   :  { %2456 = vmatprep.subr.bf16.mxu0 %v3222_v17 }
 0x590   :  { %2457 = vmatpush1.bf16.msra.mxu0 %v3220_v18 }
 0x591   :  { %2458 = vmatprep.subr.bf16.mxu0 %v3225_v19 }
 0x594   :  { %2459 = vmatpush1.bf16.msra.mxu0 %v3223_v55 }
 0x595   :  { %2460 = vmatprep.subr.bf16.mxu0 %v3228_v20 }
 0x598   :  { %2461 = vmatpush1.bf16.msra.mxu0 %v3226_v46 }
 0x599   :  { %2462 = vmatprep.subr.bf16.mxu0 %v3231_v21 }
 0x59c   :  { %2463 = vmatpush1.bf16.msra.mxu0 %v3229_v22 }
 0x59f   :  { %2465 = vmatmul.mubr.bf16.vlgmr.msra.gmra.mrb[8].mxu0 %v3681_v2 }
 0x672   :  { %v2466_v31 = vpop.f32.mrb[8].mxu0 }
 0x673   :  { %v2792_v24 = vadd.f32 %v2466_v31, %v2062_v25  ;;  %v2468_v63 = vpop.f32.mrb[9].mxu0 }
 0x674   :  { %v2793_v32 = vadd.f32 %v2468_v63, %v2066_v29  ;;  %v2470_v26 = vpop.f32.mrb[10].mxu0 }
 0x675   :  { %2475 = vst [vmem:[#allocation10] sm:$0xff] %v2792_v24  ;;  %v2794_v36 = vadd.f32 %v2470_v26, %v2062_v25  ;;  %v2472_v57 = vpop.f32.mrb[11].mxu0 }
 0x676   :  { %2476 = vst [vmem:[#allocation10 + $0x8] sm:$0xff] %v2793_v32  ;;  %v2795_v38 = vadd.f32 %v2472_v57, %v2066_v29 }
 0x677   :  { %2477 = vst [vmem:[#allocation10 + $0x10] sm:$0xff] %v2794_v36 }
 0x678   :  { %2478 = vst [vmem:[#allocation10 + $0x18] sm:$0xff] %v2795_v38 }
 0x679   :  { %2483 = vsyncadd [#allocation4], 256  ;;  %s3369_s22 = smov [#allocation10]  }
 0x67a   :  { %s2484_s1 = sshll.u32 %s3369_s22, 4  ;;  %s2485_s1 = int_to_ptr.vmem [resolvable:$true] %s2484_s1 }
 0x67b   :  { %s3328_s10 = scalar_lea.vmem %s2485_s1, 256  ;;  %s3332_s18 = scalar_lea.vmem %s2485_s1, 512 }
 0x67c   :  { %p3329_p4 = scmp.ne.s32.totalorder %s2485_s1, %s3328_s10  ;;  %p3333_p5 = scmp.lt.s32.totalorder %s2485_s1, %s2485_s1 }
 0x67d   :  { %p3334_p6 = scmp.lt.s32.totalorder %s3332_s18, %s3328_s10 }
 0x67f   :  { %p3335_p7 = por %p3334_p6, %p3333_p5 }
 0x681   :  { %p3336_p8 = pnand %p3335_p7, %p3329_p4 }
 0x683   :  { %3339 = shalt.err (!%p3336_p8)
}
 0x684   :  { %s3340_s25 = scalar_lea.hbm %s3715_s11, 256 }
 0x685   :  { %p3341_p9 = scmp.ne.s32.totalorder %s3715_s11, %s3340_s25  ;;  %p3344_p10 = scmp.lt.u32.totalorder %s3340_s25, %s3715_s11 }
 0x687   :  { %p3346_p11 = pnand %p3344_p10, %p3341_p9 }
 0x689   :  { %3349 = shalt.err (!%p3346_p11)
}
 0x68a   :  { %2490 = dma.vmem_to_hbm [thread:$0]  %s2485_s1, 256, %s3715_s11, [#allocation4], %s3359_s27, %s3359_s27, %s3360_s28  }
 0x68b   :  { %3356 = dma.done.wait [#allocation4], 512  }
 0x68c   :  { %3357 = vsyncadd [#allocation4], 4294966784 }
 0x68d   :  { %2494 = vsyncpa [#allocation3], 1 }
 0x68e   :  { %2495 = vsyncpa [#allocation6], 1 }
 0x68f   :  { %2496 = vsyncpa [#allocation9], 1 }
 0x690   :  { %2497 = vsyncpa [#allocation4], 1 }

</bundles_post_ra>
